<compile_context>
chip_gen: v5e
topology: v5e:2x2
jax: 0.10.0
libtpu: 0.0.40
codegen_flags: <defaults>
</compile_context>

<pallas_src>
import jax
import jax.numpy as jnp
from jax.experimental import pallas as pl
from jax.experimental.pallas import tpu as pltpu

# ----------------------------- model hyper-parameters -----------------------------
X_DIM = 4
Y_DIM = 2
R_DIM = 32
HEIGHT = 2
TEMPERATURE = 1.0


# --------------------------------- fused kernel ------------------------------------
def _fused_tree_kernel(
    xtr_ref, ytr_ref, xte_ref,                                   # per-batch activations
    ew1x_ref, ew1y_ref, eb1_ref, ew2_ref, eb2_ref,               # encoder l1 (split), l2
    ew3_ref, eb3_ref, ew4_ref, eb4_ref,                          # encoder l3, l4
    dw1a_ref, dw1b_ref, db1_ref, dw2_ref, db2_ref,               # decision MLP (l1 split), l2
    lwa_ref, lwb_ref, lb_ref,                                    # synthesized leaf head (split)
    out_ref,
):
    f32 = jnp.float32
    x_tr = xtr_ref[...]          # (N, X)
    y_tr = ytr_ref[...]          # (N, Y)
    x_te = xte_ref[...]          # (Nt, X)
    n_train = x_tr.shape[0]

    # ------------------------- Encoder: 4-layer MLP ---------------------------------
    # concat((x, y)) @ W1  ==  x @ W1[:X] + y @ W1[X:]   (concat-free, identical math)
    h = (jnp.dot(x_tr, ew1x_ref[...], preferred_element_type=f32)
         + jnp.dot(y_tr, ew1y_ref[...], preferred_element_type=f32) + eb1_ref[...])
    h = jnp.maximum(h, 0.0)
    h = jnp.maximum(jnp.dot(h, ew2_ref[...], preferred_element_type=f32) + eb2_ref[...], 0.0)
    h = jnp.maximum(jnp.dot(h, ew3_ref[...], preferred_element_type=f32) + eb3_ref[...], 0.0)
    reps = jnp.dot(h, ew4_ref[...], preferred_element_type=f32) + eb4_ref[...]      # (N, R)

    r_global = jnp.mean(reps, axis=0, keepdims=True)                                # (1, R)
    init_weights = jnp.ones((n_train, 1), f32)                                      # (N, 1)

    # ------------------------- per-node helpers -------------------------------------
    def decision_params(local_rep):
        # concat((local_rep, r)) @ W1 == local_rep @ W1[:R] + r @ W1[R:]
        hh = (jnp.dot(local_rep, dw1a_ref[...], preferred_element_type=f32)
              + jnp.dot(r_global, dw1b_ref[...], preferred_element_type=f32) + db1_ref[...])
        hh = jnp.maximum(hh, 0.0)
        p = jnp.dot(hh, dw2_ref[...], preferred_element_type=f32) + db2_ref[...]    # (1, X+2)
        nw = p[:, :X_DIM]
        nb = p[:, X_DIM:X_DIM + 1]
        nbeta = p[:, X_DIM + 1:X_DIM + 2]
        # dist_func: softmax over the feature axis (hand-rolled, stays in-kernel)
        z = nw * TEMPERATURE
        z = z - jnp.max(z, axis=-1, keepdims=True)
        e = jnp.exp(z)
        dwts = e / jnp.sum(e, axis=-1, keepdims=True)                               # (1, X)
        return dwts, nb, nbeta

    def leaf_params(local_rep):
        # TODO(synk): leaf_builder is an external dependency not defined in the reference
        # module; synthesized as a per-batch linear readout leaf (rep -> Wl, bl), same as
        # the previously accepted version.
        return (jnp.dot(local_rep, lwa_ref[...], preferred_element_type=f32)
                + jnp.dot(r_global, lwb_ref[...], preferred_element_type=f32)
                + lb_ref[...])                                                       # (1, X*Y + Y)

    def leaf_predict(p, x):
        # Wl[y, x] = p[0, y*X + x];  bl[y] = p[0, X*Y + y];  pred = x @ Wl^T + bl
        # Done with static lane slices + one-hot accumulation (no in-kernel reshape).
        out = p[:, X_DIM * Y_DIM:]                                                   # (1, Y)
        for yj in range(Y_DIM):
            w_row = p[:, yj * X_DIM:(yj + 1) * X_DIM]                                # (1, X)
            col = jnp.sum(x * w_row, axis=1, keepdims=True)                          # (rows, 1)
            onehot = (jax.lax.broadcasted_iota(jnp.int32, (1, Y_DIM), 1) == yj).astype(f32)
            out = out + col * onehot                                                 # (rows, Y)
        return out

    def right_probs(dwts, nb, nbeta, x):
        # einsum('nd,d->n') done as a broadcast-multiply + lane reduce (D=4, register-resident)
        s = jnp.sum(x * dwts, axis=1, keepdims=True) + nb                            # (rows, 1)
        return jax.nn.sigmoid(s * nbeta)

    # ------------------------- tree build (static unroll) ---------------------------
    def get_node(weights, height):
        # weighted_mean: eps-stabilized weighted average over the sample axis
        # TODO(synk): `weighted_mean` is referenced but not defined in the source.
        den = jnp.sum(weights, axis=0, keepdims=True) + 1e-8                         # (1, 1)
        local_rep = jnp.sum(reps * weights, axis=0, keepdims=True) / den             # (1, R)
        if height == 0:
            return ("leaf", leaf_params(local_rep))

        dwts, nb, nbeta = decision_params(local_rep)
        rp = right_probs(dwts, nb, nbeta, x_tr)                                      # (N, 1)
        mask = (rp > 0.5).astype(f32)                                                # == round(rp)
        right_w = weights * mask
        left_w = weights * (1.0 - mask)
        stop = jnp.logical_or(
            jnp.sum(right_w, axis=0, keepdims=True) == 0.0,
            jnp.sum(left_w, axis=0, keepdims=True) == 0.0).astype(f32)               # (1, 1)

        leaf = ("leaf", leaf_params(local_rep))
        # NOTE: the reference early-returns `leaf` when stop.all(); the statically unrolled
        # full tree is numerically identical because (1 - stop) masks the subtree predictions.
        right = get_node(right_w, height - 1)
        left = get_node(left_w, height - 1)
        return ("tree", dwts, nb, nbeta, stop, leaf, right, left)

    def predict(node, x):
        if node[0] == "leaf":
            return leaf_predict(node[1], x)
        _, dwts, nb, nbeta, stop, leaf, right, left = node
        leaf_pred = leaf_predict(leaf[1], x)
        right_pred = predict(right, x)
        left_pred = predict(left, x)
        rp = right_probs(dwts, nb, nbeta, x)                                         # (Nt, 1)
        nxt = (1.0 - rp) * left_pred + rp * right_pred
        return stop * leaf_pred + (1.0 - stop) * nxt

    tree = get_node(init_weights, HEIGHT)
    out_ref[...] = predict(tree, x_te)                                               # (Nt, Y)


# --------------------------------- parameter init ----------------------------------
def _linear_init(key, fan_in, fan_out):
    k1, k2 = jax.random.split(key)
    bound = 1.0 / jnp.sqrt(jnp.float32(fan_in))
    w = jax.random.uniform(k1, (fan_in, fan_out), jnp.float32, -bound, bound)
    b = jax.random.uniform(k2, (1, fan_out), jnp.float32, -bound, bound)
    return w, b


def init_params(key):
    keys = jax.random.split(key, 7)
    return {
        "enc": [
            _linear_init(keys[0], X_DIM + Y_DIM, R_DIM),
            _linear_init(keys[1], R_DIM, R_DIM),
            _linear_init(keys[2], R_DIM, R_DIM),
            _linear_init(keys[3], R_DIM, R_DIM),
        ],
        "dec1": _linear_init(keys[4], 2 * R_DIM, 50),
        "dec2": _linear_init(keys[5], 50, X_DIM + 2),
        "leaf": _linear_init(keys[6], 2 * R_DIM, X_DIM * Y_DIM + Y_DIM),
    }


# ------------------------------------ model ----------------------------------------
@jax.jit
def tree_model_forward(params, x_train, y_train, x_test):
    B, N, _ = x_train.shape
    Nt = x_test.shape[1]

    (e1w, e1b), (e2w, e2b), (e3w, e3b), (e4w, e4b) = params["enc"]
    d1w, d1b = params["dec1"]
    d2w, d2b = params["dec2"]
    lw, lb = params["leaf"]

    # Host-side (traced once under jit) splits of the "concat" weight matrices.
    weight_args = (
        e1w[:X_DIM], e1w[X_DIM:], e1b, e2w, e2b, e3w, e3b, e4w, e4b,
        d1w[:R_DIM], d1w[R_DIM:], d1b, d2w, d2b,
        lw[:R_DIM], lw[R_DIM:], lb,
    )

    batch_specs = [
        pl.BlockSpec((None, N, X_DIM), lambda b: (b, 0, 0)),
        pl.BlockSpec((None, N, Y_DIM), lambda b: (b, 0, 0)),
        pl.BlockSpec((None, Nt, X_DIM), lambda b: (b, 0, 0)),
    ]
    # Weights are replicated across the batch grid (index_map -> block 0): DMA'd once,
    # resident in VMEM for all grid steps.
    weight_specs = [pl.BlockSpec(w.shape, lambda b: (0, 0)) for w in weight_args]

    return pl.pallas_call(
        _fused_tree_kernel,
        grid=(B,),
        in_specs=batch_specs + weight_specs,
        out_specs=pl.BlockSpec((None, Nt, Y_DIM), lambda b: (b, 0, 0)),
        out_shape=jax.ShapeDtypeStruct((B, Nt, Y_DIM), jnp.float32),
        compiler_params=pltpu.CompilerParams(
            dimension_semantics=("parallel",),   # lets v7x shard batch across its 2 TCs
        ),
    )(x_train, y_train, x_test, *weight_args)


# ------------------------------------- main -----------------------------------------
if __name__ == "__main__":
    key = jax.random.PRNGKey(0)
    kp, kx, ky, kt = jax.random.split(key, 4)
    params = init_params(kp)

    B, N_TRAIN, N_TEST = 2, 8, 8
    x_train = jax.random.normal(kx, (B, N_TRAIN, X_DIM), jnp.float32)
    y_train = jax.random.normal(ky, (B, N_TRAIN, Y_DIM), jnp.float32)
    x_test = jax.random.normal(kt, (B, N_TEST, X_DIM), jnp.float32)

    out = tree_model_forward(params, x_train, y_train, x_test)
    out = jax.block_until_ready(out)
    assert out.shape == (B, N_TEST, Y_DIM), out.shape
    assert bool(jnp.all(jnp.isfinite(out)))
    print("KERNEL_OK")
</pallas_src>

<mosaic_0001>
module attributes {stable_mosaic.version = 11 : i64} {
  func.func @_fused_tree_kernel(%arg0: i32, %arg1: memref<1x8x4xf32, #tpu.memory_space<vmem>>, %arg2: memref<1x8x2xf32, #tpu.memory_space<vmem>>, %arg3: memref<1x8x4xf32, #tpu.memory_space<vmem>>, %arg4: memref<4x32xf32, #tpu.memory_space<vmem>>, %arg5: memref<2x32xf32, #tpu.memory_space<vmem>>, %arg6: memref<1x32xf32, #tpu.memory_space<vmem>>, %arg7: memref<32x32xf32, #tpu.memory_space<vmem>>, %arg8: memref<1x32xf32, #tpu.memory_space<vmem>>, %arg9: memref<32x32xf32, #tpu.memory_space<vmem>>, %arg10: memref<1x32xf32, #tpu.memory_space<vmem>>, %arg11: memref<32x32xf32, #tpu.memory_space<vmem>>, %arg12: memref<1x32xf32, #tpu.memory_space<vmem>>, %arg13: memref<32x50xf32, #tpu.memory_space<vmem>>, %arg14: memref<32x50xf32, #tpu.memory_space<vmem>>, %arg15: memref<1x50xf32, #tpu.memory_space<vmem>>, %arg16: memref<50x6xf32, #tpu.memory_space<vmem>>, %arg17: memref<1x6xf32, #tpu.memory_space<vmem>>, %arg18: memref<32x10xf32, #tpu.memory_space<vmem>>, %arg19: memref<32x10xf32, #tpu.memory_space<vmem>>, %arg20: memref<1x10xf32, #tpu.memory_space<vmem>>, %arg21: memref<1x8x2xf32, #tpu.memory_space<vmem>>) attributes {dimension_semantics = [#tpu.dimension_semantics<parallel>], iteration_bounds = array<i64: 2>, scalar_prefetch = 0 : i64, scratch_operands = 0 : i64, tpu.core_type = #tpu.core_type<tc>, window_params = [{transform_indices = @transform_0, window_bounds = array<i64: 1, 8, 4>}, {transform_indices = @transform_1, window_bounds = array<i64: 1, 8, 2>}, {transform_indices = @transform_2, window_bounds = array<i64: 1, 8, 4>}, {pipeline_mode = #tpu.pipeline_mode<synchronous>, transform_indices = @transform_3, window_bounds = array<i64: 4, 32>}, {pipeline_mode = #tpu.pipeline_mode<synchronous>, transform_indices = @transform_4, window_bounds = array<i64: 2, 32>}, {pipeline_mode = #tpu.pipeline_mode<synchronous>, transform_indices = @transform_5, window_bounds = array<i64: 1, 32>}, {pipeline_mode = #tpu.pipeline_mode<synchronous>, transform_indices = @transform_6, window_bounds = array<i64: 32, 32>}, {pipeline_mode = #tpu.pipeline_mode<synchronous>, transform_indices = @transform_7, window_bounds = array<i64: 1, 32>}, {pipeline_mode = #tpu.pipeline_mode<synchronous>, transform_indices = @transform_8, window_bounds = array<i64: 32, 32>}, {pipeline_mode = #tpu.pipeline_mode<synchronous>, transform_indices = @transform_9, window_bounds = array<i64: 1, 32>}, {pipeline_mode = #tpu.pipeline_mode<synchronous>, transform_indices = @transform_10, window_bounds = array<i64: 32, 32>}, {pipeline_mode = #tpu.pipeline_mode<synchronous>, transform_indices = @transform_11, window_bounds = array<i64: 1, 32>}, {pipeline_mode = #tpu.pipeline_mode<synchronous>, transform_indices = @transform_12, window_bounds = array<i64: 32, 50>}, {pipeline_mode = #tpu.pipeline_mode<synchronous>, transform_indices = @transform_13, window_bounds = array<i64: 32, 50>}, {pipeline_mode = #tpu.pipeline_mode<synchronous>, transform_indices = @transform_14, window_bounds = array<i64: 1, 50>}, {pipeline_mode = #tpu.pipeline_mode<synchronous>, transform_indices = @transform_15, window_bounds = array<i64: 50, 6>}, {pipeline_mode = #tpu.pipeline_mode<synchronous>, transform_indices = @transform_16, window_bounds = array<i64: 1, 6>}, {pipeline_mode = #tpu.pipeline_mode<synchronous>, transform_indices = @transform_17, window_bounds = array<i64: 32, 10>}, {pipeline_mode = #tpu.pipeline_mode<synchronous>, transform_indices = @transform_18, window_bounds = array<i64: 32, 10>}, {pipeline_mode = #tpu.pipeline_mode<synchronous>, transform_indices = @transform_19, window_bounds = array<i64: 1, 10>}, {transform_indices = @transform_20, window_bounds = array<i64: 1, 8, 2>}]} {
    %c0 = arith.constant 0 : index
    %c0_0 = arith.constant 0 : index
    %c0_1 = arith.constant 0 : index
    %0 = vector.load %arg1[%c0, %c0_0, %c0_1] : memref<1x8x4xf32, #tpu.memory_space<vmem>>, vector<1x8x4xf32>
    %1 = vector.shape_cast %0 : vector<1x8x4xf32> to vector<8x4xf32>
    %c0_2 = arith.constant 0 : index
    %c0_3 = arith.constant 0 : index
    %c0_4 = arith.constant 0 : index
    %2 = vector.load %arg2[%c0_2, %c0_3, %c0_4] : memref<1x8x2xf32, #tpu.memory_space<vmem>>, vector<1x8x2xf32>
    %3 = vector.shape_cast %2 : vector<1x8x2xf32> to vector<8x2xf32>
    %c0_5 = arith.constant 0 : index
    %c0_6 = arith.constant 0 : index
    %c0_7 = arith.constant 0 : index
    %4 = vector.load %arg3[%c0_5, %c0_6, %c0_7] : memref<1x8x4xf32, #tpu.memory_space<vmem>>, vector<1x8x4xf32>
    %5 = vector.shape_cast %4 : vector<1x8x4xf32> to vector<8x4xf32>
    %c0_8 = arith.constant 0 : index
    %c0_9 = arith.constant 0 : index
    %6 = vector.load %arg4[%c0_8, %c0_9] : memref<4x32xf32, #tpu.memory_space<vmem>>, vector<4x32xf32>
    %cst = arith.constant dense<0.000000e+00> : vector<8x32xf32>
    %7 = tpu.matmul %1, %6, %cst {dimension_numbers = #tpu.dot_dimension_numbers<[1], [0], [0], [1], [0, 0, 1, 1], [], []>} : vector<8x4xf32>, vector<4x32xf32>, vector<8x32xf32> -> vector<8x32xf32>
    %c0_10 = arith.constant 0 : index
    %c0_11 = arith.constant 0 : index
    %8 = vector.load %arg5[%c0_10, %c0_11] : memref<2x32xf32, #tpu.memory_space<vmem>>, vector<2x32xf32>
    %cst_12 = arith.constant dense<0.000000e+00> : vector<8x32xf32>
    %9 = tpu.matmul %3, %8, %cst_12 {dimension_numbers = #tpu.dot_dimension_numbers<[1], [0], [0], [1], [0, 0, 1, 1], [], []>} : vector<8x2xf32>, vector<2x32xf32>, vector<8x32xf32> -> vector<8x32xf32>
    %10 = arith.addf %7, %9 : vector<8x32xf32>
    %c0_13 = arith.constant 0 : index
    %c0_14 = arith.constant 0 : index
    %11 = vector.load %arg6[%c0_13, %c0_14] : memref<1x32xf32, #tpu.memory_space<vmem>>, vector<1x32xf32>
    %12 = vector.broadcast %11 : vector<1x32xf32> to vector<8x32xf32>
    %13 = arith.addf %10, %12 : vector<8x32xf32>
    %cst_15 = arith.constant 0.000000e+00 : f32
    %14 = vector.broadcast %cst_15 : f32 to vector<8x32xf32>
    %15 = arith.maximumf %13, %14 : vector<8x32xf32>
    %c0_16 = arith.constant 0 : index
    %c0_17 = arith.constant 0 : index
    %16 = vector.load %arg7[%c0_16, %c0_17] : memref<32x32xf32, #tpu.memory_space<vmem>>, vector<32x32xf32>
    %cst_18 = arith.constant dense<0.000000e+00> : vector<8x32xf32>
    %17 = tpu.matmul %15, %16, %cst_18 {dimension_numbers = #tpu.dot_dimension_numbers<[1], [0], [0], [1], [0, 0, 1, 1], [], []>} : vector<8x32xf32>, vector<32x32xf32>, vector<8x32xf32> -> vector<8x32xf32>
    %c0_19 = arith.constant 0 : index
    %c0_20 = arith.constant 0 : index
    %18 = vector.load %arg8[%c0_19, %c0_20] : memref<1x32xf32, #tpu.memory_space<vmem>>, vector<1x32xf32>
    %19 = vector.broadcast %18 : vector<1x32xf32> to vector<8x32xf32>
    %20 = arith.addf %17, %19 : vector<8x32xf32>
    %cst_21 = arith.constant 0.000000e+00 : f32
    %21 = vector.broadcast %cst_21 : f32 to vector<8x32xf32>
    %22 = arith.maximumf %20, %21 : vector<8x32xf32>
    %c0_22 = arith.constant 0 : index
    %c0_23 = arith.constant 0 : index
    %23 = vector.load %arg9[%c0_22, %c0_23] : memref<32x32xf32, #tpu.memory_space<vmem>>, vector<32x32xf32>
    %cst_24 = arith.constant dense<0.000000e+00> : vector<8x32xf32>
    %24 = tpu.matmul %22, %23, %cst_24 {dimension_numbers = #tpu.dot_dimension_numbers<[1], [0], [0], [1], [0, 0, 1, 1], [], []>} : vector<8x32xf32>, vector<32x32xf32>, vector<8x32xf32> -> vector<8x32xf32>
    %c0_25 = arith.constant 0 : index
    %c0_26 = arith.constant 0 : index
    %25 = vector.load %arg10[%c0_25, %c0_26] : memref<1x32xf32, #tpu.memory_space<vmem>>, vector<1x32xf32>
    %26 = vector.broadcast %25 : vector<1x32xf32> to vector<8x32xf32>
    %27 = arith.addf %24, %26 : vector<8x32xf32>
    %cst_27 = arith.constant 0.000000e+00 : f32
    %28 = vector.broadcast %cst_27 : f32 to vector<8x32xf32>
    %29 = arith.maximumf %27, %28 : vector<8x32xf32>
    %c0_28 = arith.constant 0 : index
    %c0_29 = arith.constant 0 : index
    %30 = vector.load %arg11[%c0_28, %c0_29] : memref<32x32xf32, #tpu.memory_space<vmem>>, vector<32x32xf32>
    %cst_30 = arith.constant dense<0.000000e+00> : vector<8x32xf32>
    %31 = tpu.matmul %29, %30, %cst_30 {dimension_numbers = #tpu.dot_dimension_numbers<[1], [0], [0], [1], [0, 0, 1, 1], [], []>} : vector<8x32xf32>, vector<32x32xf32>, vector<8x32xf32> -> vector<8x32xf32>
    %c0_31 = arith.constant 0 : index
    %c0_32 = arith.constant 0 : index
    %32 = vector.load %arg12[%c0_31, %c0_32] : memref<1x32xf32, #tpu.memory_space<vmem>>, vector<1x32xf32>
    %33 = vector.broadcast %32 : vector<1x32xf32> to vector<8x32xf32>
    %34 = arith.addf %31, %33 : vector<8x32xf32>
    %cst_33 = arith.constant dense<0.000000e+00> : vector<32xf32>
    %35 = vector.multi_reduction <add>, %34, %cst_33 [0] : vector<8x32xf32> to vector<32xf32>
    %36 = vector.shape_cast %35 : vector<32xf32> to vector<1x32xf32>
    %cst_34 = arith.constant 8.000000e+00 : f32
    %37 = vector.broadcast %cst_34 : f32 to vector<1x32xf32>
    %38 = arith.divf %36, %37 : vector<1x32xf32>
    %cst_35 = arith.constant 1.000000e+00 : f32
    %39 = vector.broadcast %cst_35 : f32 to vector<8x1xf32>
    %cst_36 = arith.constant dense<0.000000e+00> : vector<1xf32>
    %40 = vector.multi_reduction <add>, %39, %cst_36 [0] : vector<8x1xf32> to vector<1xf32>
    %41 = vector.shape_cast %40 : vector<1xf32> to vector<1x1xf32>
    %cst_37 = arith.constant 9.99999993E-9 : f32
    %42 = vector.broadcast %cst_37 : f32 to vector<1x1xf32>
    %43 = arith.addf %41, %42 : vector<1x1xf32>
    %44 = vector.broadcast %39 : vector<8x1xf32> to vector<8x32xf32>
    %45 = arith.mulf %34, %44 : vector<8x32xf32>
    %cst_38 = arith.constant dense<0.000000e+00> : vector<32xf32>
    %46 = vector.multi_reduction <add>, %45, %cst_38 [0] : vector<8x32xf32> to vector<32xf32>
    %47 = vector.shape_cast %46 : vector<32xf32> to vector<1x32xf32>
    %48 = vector.broadcast %43 : vector<1x1xf32> to vector<1x32xf32>
    %49 = arith.divf %47, %48 : vector<1x32xf32>
    %c0_39 = arith.constant 0 : index
    %c0_40 = arith.constant 0 : index
    %50 = vector.load %arg13[%c0_39, %c0_40] : memref<32x50xf32, #tpu.memory_space<vmem>>, vector<32x50xf32>
    %cst_41 = arith.constant dense<0.000000e+00> : vector<1x50xf32>
    %51 = tpu.matmul %49, %50, %cst_41 {dimension_numbers = #tpu.dot_dimension_numbers<[1], [0], [0], [1], [0, 0, 1, 1], [], []>} : vector<1x32xf32>, vector<32x50xf32>, vector<1x50xf32> -> vector<1x50xf32>
    %c0_42 = arith.constant 0 : index
    %c0_43 = arith.constant 0 : index
    %52 = vector.load %arg14[%c0_42, %c0_43] : memref<32x50xf32, #tpu.memory_space<vmem>>, vector<32x50xf32>
    %cst_44 = arith.constant dense<0.000000e+00> : vector<1x50xf32>
    %53 = tpu.matmul %38, %52, %cst_44 {dimension_numbers = #tpu.dot_dimension_numbers<[1], [0], [0], [1], [0, 0, 1, 1], [], []>} : vector<1x32xf32>, vector<32x50xf32>, vector<1x50xf32> -> vector<1x50xf32>
    %54 = arith.addf %51, %53 : vector<1x50xf32>
    %c0_45 = arith.constant 0 : index
    %c0_46 = arith.constant 0 : index
    %55 = vector.load %arg15[%c0_45, %c0_46] : memref<1x50xf32, #tpu.memory_space<vmem>>, vector<1x50xf32>
    %56 = arith.addf %54, %55 : vector<1x50xf32>
    %cst_47 = arith.constant 0.000000e+00 : f32
    %57 = vector.broadcast %cst_47 : f32 to vector<1x50xf32>
    %58 = arith.maximumf %56, %57 : vector<1x50xf32>
    %c0_48 = arith.constant 0 : index
    %c0_49 = arith.constant 0 : index
    %59 = vector.load %arg16[%c0_48, %c0_49] : memref<50x6xf32, #tpu.memory_space<vmem>>, vector<50x6xf32>
    %cst_50 = arith.constant dense<0.000000e+00> : vector<1x6xf32>
    %60 = tpu.matmul %58, %59, %cst_50 {dimension_numbers = #tpu.dot_dimension_numbers<[1], [0], [0], [1], [0, 0, 1, 1], [], []>} : vector<1x50xf32>, vector<50x6xf32>, vector<1x6xf32> -> vector<1x6xf32>
    %c0_51 = arith.constant 0 : index
    %c0_52 = arith.constant 0 : index
    %61 = vector.load %arg17[%c0_51, %c0_52] : memref<1x6xf32, #tpu.memory_space<vmem>>, vector<1x6xf32>
    %62 = arith.addf %60, %61 : vector<1x6xf32>
    %63 = vector.extract_strided_slice %62 {offsets = [0, 0], sizes = [1, 4], strides = [1, 1]} : vector<1x6xf32> to vector<1x4xf32>
    %64 = vector.extract_strided_slice %62 {offsets = [0, 4], sizes = [1, 1], strides = [1, 1]} : vector<1x6xf32> to vector<1x1xf32>
    %65 = vector.extract_strided_slice %62 {offsets = [0, 5], sizes = [1, 1], strides = [1, 1]} : vector<1x6xf32> to vector<1x1xf32>
    %cst_53 = arith.constant 1.000000e+00 : f32
    %66 = vector.broadcast %cst_53 : f32 to vector<1x4xf32>
    %67 = arith.mulf %63, %66 : vector<1x4xf32>
    %cst_54 = arith.constant dense<0xFF800000> : vector<1xf32>
    %68 = vector.multi_reduction <maximumf>, %67, %cst_54 [1] : vector<1x4xf32> to vector<1xf32>
    %69 = vector.shape_cast %68 : vector<1xf32> to vector<1x1xf32>
    %70 = vector.broadcast %69 : vector<1x1xf32> to vector<1x4xf32>
    %71 = arith.subf %67, %70 : vector<1x4xf32>
    %72 = math.exp %71 : vector<1x4xf32>
    %cst_55 = arith.constant dense<0.000000e+00> : vector<1xf32>
    %73 = vector.multi_reduction <add>, %72, %cst_55 [1] : vector<1x4xf32> to vector<1xf32>
    %74 = vector.shape_cast %73 : vector<1xf32> to vector<1x1xf32>
    %75 = vector.broadcast %74 : vector<1x1xf32> to vector<1x4xf32>
    %76 = arith.divf %72, %75 : vector<1x4xf32>
    %77 = vector.broadcast %76 : vector<1x4xf32> to vector<8x4xf32>
    %78 = arith.mulf %1, %77 : vector<8x4xf32>
    %cst_56 = arith.constant dense<0.000000e+00> : vector<8xf32>
    %79 = vector.multi_reduction <add>, %78, %cst_56 [1] : vector<8x4xf32> to vector<8xf32>
    %80 = vector.shape_cast %79 : vector<8xf32> to vector<8x1xf32>
    %81 = vector.broadcast %64 : vector<1x1xf32> to vector<8x1xf32>
    %82 = arith.addf %80, %81 : vector<8x1xf32>
    %83 = vector.broadcast %65 : vector<1x1xf32> to vector<8x1xf32>
    %84 = arith.mulf %82, %83 : vector<8x1xf32>
    %85 = arith.negf %84 : vector<8x1xf32>
    %86 = math.exp %85 : vector<8x1xf32>
    %cst_57 = arith.constant 1.000000e+00 : f32
    %87 = vector.broadcast %cst_57 : f32 to vector<8x1xf32>
    %88 = arith.addf %87, %86 : vector<8x1xf32>
    %89 = arith.divf %87, %88 : vector<8x1xf32>
    %cst_58 = arith.constant 5.000000e-01 : f32
    %90 = vector.broadcast %cst_58 : f32 to vector<8x1xf32>
    %91 = arith.cmpf ogt, %89, %90 : vector<8x1xf32>
    %92 = arith.extui %91 : vector<8x1xi1> to vector<8x1xi32>
    %93 = arith.sitofp %92 : vector<8x1xi32> to vector<8x1xf32>
    %94 = arith.mulf %39, %93 : vector<8x1xf32>
    %cst_59 = arith.constant 1.000000e+00 : f32
    %95 = vector.broadcast %cst_59 : f32 to vector<8x1xf32>
    %96 = arith.subf %95, %93 : vector<8x1xf32>
    %97 = arith.mulf %39, %96 : vector<8x1xf32>
    %cst_60 = arith.constant dense<0.000000e+00> : vector<1xf32>
    %98 = vector.multi_reduction <add>, %94, %cst_60 [0] : vector<8x1xf32> to vector<1xf32>
    %99 = vector.shape_cast %98 : vector<1xf32> to vector<1x1xf32>
    %cst_61 = arith.constant 0.000000e+00 : f32
    %100 = vector.broadcast %cst_61 : f32 to vector<1x1xf32>
    %101 = arith.cmpf oeq, %99, %100 : vector<1x1xf32>
    %cst_62 = arith.constant dense<0.000000e+00> : vector<1xf32>
    %102 = vector.multi_reduction <add>, %97, %cst_62 [0] : vector<8x1xf32> to vector<1xf32>
    %103 = vector.shape_cast %102 : vector<1xf32> to vector<1x1xf32>
    %cst_63 = arith.constant 0.000000e+00 : f32
    %104 = vector.broadcast %cst_63 : f32 to vector<1x1xf32>
    %105 = arith.cmpf oeq, %103, %104 : vector<1x1xf32>
    %106 = arith.ori %101, %105 : vector<1x1xi1>
    %107 = arith.extui %106 : vector<1x1xi1> to vector<1x1xi32>
    %108 = arith.sitofp %107 : vector<1x1xi32> to vector<1x1xf32>
    %c0_64 = arith.constant 0 : index
    %c0_65 = arith.constant 0 : index
    %109 = vector.load %arg18[%c0_64, %c0_65] : memref<32x10xf32, #tpu.memory_space<vmem>>, vector<32x10xf32>
    %cst_66 = arith.constant dense<0.000000e+00> : vector<1x10xf32>
    %110 = tpu.matmul %49, %109, %cst_66 {dimension_numbers = #tpu.dot_dimension_numbers<[1], [0], [0], [1], [0, 0, 1, 1], [], []>} : vector<1x32xf32>, vector<32x10xf32>, vector<1x10xf32> -> vector<1x10xf32>
    %c0_67 = arith.constant 0 : index
    %c0_68 = arith.constant 0 : index
    %111 = vector.load %arg19[%c0_67, %c0_68] : memref<32x10xf32, #tpu.memory_space<vmem>>, vector<32x10xf32>
    %cst_69 = arith.constant dense<0.000000e+00> : vector<1x10xf32>
    %112 = tpu.matmul %38, %111, %cst_69 {dimension_numbers = #tpu.dot_dimension_numbers<[1], [0], [0], [1], [0, 0, 1, 1], [], []>} : vector<1x32xf32>, vector<32x10xf32>, vector<1x10xf32> -> vector<1x10xf32>
    %113 = arith.addf %110, %112 : vector<1x10xf32>
    %c0_70 = arith.constant 0 : index
    %c0_71 = arith.constant 0 : index
    %114 = vector.load %arg20[%c0_70, %c0_71] : memref<1x10xf32, #tpu.memory_space<vmem>>, vector<1x10xf32>
    %115 = arith.addf %113, %114 : vector<1x10xf32>
    %cst_72 = arith.constant dense<0.000000e+00> : vector<1xf32>
    %116 = vector.multi_reduction <add>, %94, %cst_72 [0] : vector<8x1xf32> to vector<1xf32>
    %117 = vector.shape_cast %116 : vector<1xf32> to vector<1x1xf32>
    %cst_73 = arith.constant 9.99999993E-9 : f32
    %118 = vector.broadcast %cst_73 : f32 to vector<1x1xf32>
    %119 = arith.addf %117, %118 : vector<1x1xf32>
    %120 = vector.broadcast %94 : vector<8x1xf32> to vector<8x32xf32>
    %121 = arith.mulf %34, %120 : vector<8x32xf32>
    %cst_74 = arith.constant dense<0.000000e+00> : vector<32xf32>
    %122 = vector.multi_reduction <add>, %121, %cst_74 [0] : vector<8x32xf32> to vector<32xf32>
    %123 = vector.shape_cast %122 : vector<32xf32> to vector<1x32xf32>
    %124 = vector.broadcast %119 : vector<1x1xf32> to vector<1x32xf32>
    %125 = arith.divf %123, %124 : vector<1x32xf32>
    %c0_75 = arith.constant 0 : index
    %c0_76 = arith.constant 0 : index
    %126 = vector.load %arg13[%c0_75, %c0_76] : memref<32x50xf32, #tpu.memory_space<vmem>>, vector<32x50xf32>
    %cst_77 = arith.constant dense<0.000000e+00> : vector<1x50xf32>
    %127 = tpu.matmul %125, %126, %cst_77 {dimension_numbers = #tpu.dot_dimension_numbers<[1], [0], [0], [1], [0, 0, 1, 1], [], []>} : vector<1x32xf32>, vector<32x50xf32>, vector<1x50xf32> -> vector<1x50xf32>
    %c0_78 = arith.constant 0 : index
    %c0_79 = arith.constant 0 : index
    %128 = vector.load %arg14[%c0_78, %c0_79] : memref<32x50xf32, #tpu.memory_space<vmem>>, vector<32x50xf32>
    %cst_80 = arith.constant dense<0.000000e+00> : vector<1x50xf32>
    %129 = tpu.matmul %38, %128, %cst_80 {dimension_numbers = #tpu.dot_dimension_numbers<[1], [0], [0], [1], [0, 0, 1, 1], [], []>} : vector<1x32xf32>, vector<32x50xf32>, vector<1x50xf32> -> vector<1x50xf32>
    %130 = arith.addf %127, %129 : vector<1x50xf32>
    %c0_81 = arith.constant 0 : index
    %c0_82 = arith.constant 0 : index
    %131 = vector.load %arg15[%c0_81, %c0_82] : memref<1x50xf32, #tpu.memory_space<vmem>>, vector<1x50xf32>
    %132 = arith.addf %130, %131 : vector<1x50xf32>
    %cst_83 = arith.constant 0.000000e+00 : f32
    %133 = vector.broadcast %cst_83 : f32 to vector<1x50xf32>
    %134 = arith.maximumf %132, %133 : vector<1x50xf32>
    %c0_84 = arith.constant 0 : index
    %c0_85 = arith.constant 0 : index
    %135 = vector.load %arg16[%c0_84, %c0_85] : memref<50x6xf32, #tpu.memory_space<vmem>>, vector<50x6xf32>
    %cst_86 = arith.constant dense<0.000000e+00> : vector<1x6xf32>
    %136 = tpu.matmul %134, %135, %cst_86 {dimension_numbers = #tpu.dot_dimension_numbers<[1], [0], [0], [1], [0, 0, 1, 1], [], []>} : vector<1x50xf32>, vector<50x6xf32>, vector<1x6xf32> -> vector<1x6xf32>
    %c0_87 = arith.constant 0 : index
    %c0_88 = arith.constant 0 : index
    %137 = vector.load %arg17[%c0_87, %c0_88] : memref<1x6xf32, #tpu.memory_space<vmem>>, vector<1x6xf32>
    %138 = arith.addf %136, %137 : vector<1x6xf32>
    %139 = vector.extract_strided_slice %138 {offsets = [0, 0], sizes = [1, 4], strides = [1, 1]} : vector<1x6xf32> to vector<1x4xf32>
    %140 = vector.extract_strided_slice %138 {offsets = [0, 4], sizes = [1, 1], strides = [1, 1]} : vector<1x6xf32> to vector<1x1xf32>
    %141 = vector.extract_strided_slice %138 {offsets = [0, 5], sizes = [1, 1], strides = [1, 1]} : vector<1x6xf32> to vector<1x1xf32>
    %cst_89 = arith.constant 1.000000e+00 : f32
    %142 = vector.broadcast %cst_89 : f32 to vector<1x4xf32>
    %143 = arith.mulf %139, %142 : vector<1x4xf32>
    %cst_90 = arith.constant dense<0xFF800000> : vector<1xf32>
    %144 = vector.multi_reduction <maximumf>, %143, %cst_90 [1] : vector<1x4xf32> to vector<1xf32>
    %145 = vector.shape_cast %144 : vector<1xf32> to vector<1x1xf32>
    %146 = vector.broadcast %145 : vector<1x1xf32> to vector<1x4xf32>
    %147 = arith.subf %143, %146 : vector<1x4xf32>
    %148 = math.exp %147 : vector<1x4xf32>
    %cst_91 = arith.constant dense<0.000000e+00> : vector<1xf32>
    %149 = vector.multi_reduction <add>, %148, %cst_91 [1] : vector<1x4xf32> to vector<1xf32>
    %150 = vector.shape_cast %149 : vector<1xf32> to vector<1x1xf32>
    %151 = vector.broadcast %150 : vector<1x1xf32> to vector<1x4xf32>
    %152 = arith.divf %148, %151 : vector<1x4xf32>
    %153 = vector.broadcast %152 : vector<1x4xf32> to vector<8x4xf32>
    %154 = arith.mulf %1, %153 : vector<8x4xf32>
    %cst_92 = arith.constant dense<0.000000e+00> : vector<8xf32>
    %155 = vector.multi_reduction <add>, %154, %cst_92 [1] : vector<8x4xf32> to vector<8xf32>
    %156 = vector.shape_cast %155 : vector<8xf32> to vector<8x1xf32>
    %157 = vector.broadcast %140 : vector<1x1xf32> to vector<8x1xf32>
    %158 = arith.addf %156, %157 : vector<8x1xf32>
    %159 = vector.broadcast %141 : vector<1x1xf32> to vector<8x1xf32>
    %160 = arith.mulf %158, %159 : vector<8x1xf32>
    %161 = arith.negf %160 : vector<8x1xf32>
    %162 = math.exp %161 : vector<8x1xf32>
    %cst_93 = arith.constant 1.000000e+00 : f32
    %163 = vector.broadcast %cst_93 : f32 to vector<8x1xf32>
    %164 = arith.addf %163, %162 : vector<8x1xf32>
    %165 = arith.divf %163, %164 : vector<8x1xf32>
    %cst_94 = arith.constant 5.000000e-01 : f32
    %166 = vector.broadcast %cst_94 : f32 to vector<8x1xf32>
    %167 = arith.cmpf ogt, %165, %166 : vector<8x1xf32>
    %168 = arith.extui %167 : vector<8x1xi1> to vector<8x1xi32>
    %169 = arith.sitofp %168 : vector<8x1xi32> to vector<8x1xf32>
    %170 = arith.mulf %94, %169 : vector<8x1xf32>
    %cst_95 = arith.constant 1.000000e+00 : f32
    %171 = vector.broadcast %cst_95 : f32 to vector<8x1xf32>
    %172 = arith.subf %171, %169 : vector<8x1xf32>
    %173 = arith.mulf %94, %172 : vector<8x1xf32>
    %cst_96 = arith.constant dense<0.000000e+00> : vector<1xf32>
    %174 = vector.multi_reduction <add>, %170, %cst_96 [0] : vector<8x1xf32> to vector<1xf32>
    %175 = vector.shape_cast %174 : vector<1xf32> to vector<1x1xf32>
    %cst_97 = arith.constant 0.000000e+00 : f32
    %176 = vector.broadcast %cst_97 : f32 to vector<1x1xf32>
    %177 = arith.cmpf oeq, %175, %176 : vector<1x1xf32>
    %cst_98 = arith.constant dense<0.000000e+00> : vector<1xf32>
    %178 = vector.multi_reduction <add>, %173, %cst_98 [0] : vector<8x1xf32> to vector<1xf32>
    %179 = vector.shape_cast %178 : vector<1xf32> to vector<1x1xf32>
    %cst_99 = arith.constant 0.000000e+00 : f32
    %180 = vector.broadcast %cst_99 : f32 to vector<1x1xf32>
    %181 = arith.cmpf oeq, %179, %180 : vector<1x1xf32>
    %182 = arith.ori %177, %181 : vector<1x1xi1>
    %183 = arith.extui %182 : vector<1x1xi1> to vector<1x1xi32>
    %184 = arith.sitofp %183 : vector<1x1xi32> to vector<1x1xf32>
    %c0_100 = arith.constant 0 : index
    %c0_101 = arith.constant 0 : index
    %185 = vector.load %arg18[%c0_100, %c0_101] : memref<32x10xf32, #tpu.memory_space<vmem>>, vector<32x10xf32>
    %cst_102 = arith.constant dense<0.000000e+00> : vector<1x10xf32>
    %186 = tpu.matmul %125, %185, %cst_102 {dimension_numbers = #tpu.dot_dimension_numbers<[1], [0], [0], [1], [0, 0, 1, 1], [], []>} : vector<1x32xf32>, vector<32x10xf32>, vector<1x10xf32> -> vector<1x10xf32>
    %c0_103 = arith.constant 0 : index
    %c0_104 = arith.constant 0 : index
    %187 = vector.load %arg19[%c0_103, %c0_104] : memref<32x10xf32, #tpu.memory_space<vmem>>, vector<32x10xf32>
    %cst_105 = arith.constant dense<0.000000e+00> : vector<1x10xf32>
    %188 = tpu.matmul %38, %187, %cst_105 {dimension_numbers = #tpu.dot_dimension_numbers<[1], [0], [0], [1], [0, 0, 1, 1], [], []>} : vector<1x32xf32>, vector<32x10xf32>, vector<1x10xf32> -> vector<1x10xf32>
    %189 = arith.addf %186, %188 : vector<1x10xf32>
    %c0_106 = arith.constant 0 : index
    %c0_107 = arith.constant 0 : index
    %190 = vector.load %arg20[%c0_106, %c0_107] : memref<1x10xf32, #tpu.memory_space<vmem>>, vector<1x10xf32>
    %191 = arith.addf %189, %190 : vector<1x10xf32>
    %cst_108 = arith.constant dense<0.000000e+00> : vector<1xf32>
    %192 = vector.multi_reduction <add>, %170, %cst_108 [0] : vector<8x1xf32> to vector<1xf32>
    %193 = vector.shape_cast %192 : vector<1xf32> to vector<1x1xf32>
    %cst_109 = arith.constant 9.99999993E-9 : f32
    %194 = vector.broadcast %cst_109 : f32 to vector<1x1xf32>
    %195 = arith.addf %193, %194 : vector<1x1xf32>
    %196 = vector.broadcast %170 : vector<8x1xf32> to vector<8x32xf32>
    %197 = arith.mulf %34, %196 : vector<8x32xf32>
    %cst_110 = arith.constant dense<0.000000e+00> : vector<32xf32>
    %198 = vector.multi_reduction <add>, %197, %cst_110 [0] : vector<8x32xf32> to vector<32xf32>
    %199 = vector.shape_cast %198 : vector<32xf32> to vector<1x32xf32>
    %200 = vector.broadcast %195 : vector<1x1xf32> to vector<1x32xf32>
    %201 = arith.divf %199, %200 : vector<1x32xf32>
    %c0_111 = arith.constant 0 : index
    %c0_112 = arith.constant 0 : index
    %202 = vector.load %arg18[%c0_111, %c0_112] : memref<32x10xf32, #tpu.memory_space<vmem>>, vector<32x10xf32>
    %cst_113 = arith.constant dense<0.000000e+00> : vector<1x10xf32>
    %203 = tpu.matmul %201, %202, %cst_113 {dimension_numbers = #tpu.dot_dimension_numbers<[1], [0], [0], [1], [0, 0, 1, 1], [], []>} : vector<1x32xf32>, vector<32x10xf32>, vector<1x10xf32> -> vector<1x10xf32>
    %c0_114 = arith.constant 0 : index
    %c0_115 = arith.constant 0 : index
    %204 = vector.load %arg19[%c0_114, %c0_115] : memref<32x10xf32, #tpu.memory_space<vmem>>, vector<32x10xf32>
    %cst_116 = arith.constant dense<0.000000e+00> : vector<1x10xf32>
    %205 = tpu.matmul %38, %204, %cst_116 {dimension_numbers = #tpu.dot_dimension_numbers<[1], [0], [0], [1], [0, 0, 1, 1], [], []>} : vector<1x32xf32>, vector<32x10xf32>, vector<1x10xf32> -> vector<1x10xf32>
    %206 = arith.addf %203, %205 : vector<1x10xf32>
    %c0_117 = arith.constant 0 : index
    %c0_118 = arith.constant 0 : index
    %207 = vector.load %arg20[%c0_117, %c0_118] : memref<1x10xf32, #tpu.memory_space<vmem>>, vector<1x10xf32>
    %208 = arith.addf %206, %207 : vector<1x10xf32>
    %cst_119 = arith.constant dense<0.000000e+00> : vector<1xf32>
    %209 = vector.multi_reduction <add>, %173, %cst_119 [0] : vector<8x1xf32> to vector<1xf32>
    %210 = vector.shape_cast %209 : vector<1xf32> to vector<1x1xf32>
    %cst_120 = arith.constant 9.99999993E-9 : f32
    %211 = vector.broadcast %cst_120 : f32 to vector<1x1xf32>
    %212 = arith.addf %210, %211 : vector<1x1xf32>
    %213 = vector.broadcast %173 : vector<8x1xf32> to vector<8x32xf32>
    %214 = arith.mulf %34, %213 : vector<8x32xf32>
    %cst_121 = arith.constant dense<0.000000e+00> : vector<32xf32>
    %215 = vector.multi_reduction <add>, %214, %cst_121 [0] : vector<8x32xf32> to vector<32xf32>
    %216 = vector.shape_cast %215 : vector<32xf32> to vector<1x32xf32>
    %217 = vector.broadcast %212 : vector<1x1xf32> to vector<1x32xf32>
    %218 = arith.divf %216, %217 : vector<1x32xf32>
    %c0_122 = arith.constant 0 : index
    %c0_123 = arith.constant 0 : index
    %219 = vector.load %arg18[%c0_122, %c0_123] : memref<32x10xf32, #tpu.memory_space<vmem>>, vector<32x10xf32>
    %cst_124 = arith.constant dense<0.000000e+00> : vector<1x10xf32>
    %220 = tpu.matmul %218, %219, %cst_124 {dimension_numbers = #tpu.dot_dimension_numbers<[1], [0], [0], [1], [0, 0, 1, 1], [], []>} : vector<1x32xf32>, vector<32x10xf32>, vector<1x10xf32> -> vector<1x10xf32>
    %c0_125 = arith.constant 0 : index
    %c0_126 = arith.constant 0 : index
    %221 = vector.load %arg19[%c0_125, %c0_126] : memref<32x10xf32, #tpu.memory_space<vmem>>, vector<32x10xf32>
    %cst_127 = arith.constant dense<0.000000e+00> : vector<1x10xf32>
    %222 = tpu.matmul %38, %221, %cst_127 {dimension_numbers = #tpu.dot_dimension_numbers<[1], [0], [0], [1], [0, 0, 1, 1], [], []>} : vector<1x32xf32>, vector<32x10xf32>, vector<1x10xf32> -> vector<1x10xf32>
    %223 = arith.addf %220, %222 : vector<1x10xf32>
    %c0_128 = arith.constant 0 : index
    %c0_129 = arith.constant 0 : index
    %224 = vector.load %arg20[%c0_128, %c0_129] : memref<1x10xf32, #tpu.memory_space<vmem>>, vector<1x10xf32>
    %225 = arith.addf %223, %224 : vector<1x10xf32>
    %cst_130 = arith.constant dense<0.000000e+00> : vector<1xf32>
    %226 = vector.multi_reduction <add>, %97, %cst_130 [0] : vector<8x1xf32> to vector<1xf32>
    %227 = vector.shape_cast %226 : vector<1xf32> to vector<1x1xf32>
    %cst_131 = arith.constant 9.99999993E-9 : f32
    %228 = vector.broadcast %cst_131 : f32 to vector<1x1xf32>
    %229 = arith.addf %227, %228 : vector<1x1xf32>
    %230 = vector.broadcast %97 : vector<8x1xf32> to vector<8x32xf32>
    %231 = arith.mulf %34, %230 : vector<8x32xf32>
    %cst_132 = arith.constant dense<0.000000e+00> : vector<32xf32>
    %232 = vector.multi_reduction <add>, %231, %cst_132 [0] : vector<8x32xf32> to vector<32xf32>
    %233 = vector.shape_cast %232 : vector<32xf32> to vector<1x32xf32>
    %234 = vector.broadcast %229 : vector<1x1xf32> to vector<1x32xf32>
    %235 = arith.divf %233, %234 : vector<1x32xf32>
    %c0_133 = arith.constant 0 : index
    %c0_134 = arith.constant 0 : index
    %236 = vector.load %arg13[%c0_133, %c0_134] : memref<32x50xf32, #tpu.memory_space<vmem>>, vector<32x50xf32>
    %cst_135 = arith.constant dense<0.000000e+00> : vector<1x50xf32>
    %237 = tpu.matmul %235, %236, %cst_135 {dimension_numbers = #tpu.dot_dimension_numbers<[1], [0], [0], [1], [0, 0, 1, 1], [], []>} : vector<1x32xf32>, vector<32x50xf32>, vector<1x50xf32> -> vector<1x50xf32>
    %c0_136 = arith.constant 0 : index
    %c0_137 = arith.constant 0 : index
    %238 = vector.load %arg14[%c0_136, %c0_137] : memref<32x50xf32, #tpu.memory_space<vmem>>, vector<32x50xf32>
    %cst_138 = arith.constant dense<0.000000e+00> : vector<1x50xf32>
    %239 = tpu.matmul %38, %238, %cst_138 {dimension_numbers = #tpu.dot_dimension_numbers<[1], [0], [0], [1], [0, 0, 1, 1], [], []>} : vector<1x32xf32>, vector<32x50xf32>, vector<1x50xf32> -> vector<1x50xf32>
    %240 = arith.addf %237, %239 : vector<1x50xf32>
    %c0_139 = arith.constant 0 : index
    %c0_140 = arith.constant 0 : index
    %241 = vector.load %arg15[%c0_139, %c0_140] : memref<1x50xf32, #tpu.memory_space<vmem>>, vector<1x50xf32>
    %242 = arith.addf %240, %241 : vector<1x50xf32>
    %cst_141 = arith.constant 0.000000e+00 : f32
    %243 = vector.broadcast %cst_141 : f32 to vector<1x50xf32>
    %244 = arith.maximumf %242, %243 : vector<1x50xf32>
    %c0_142 = arith.constant 0 : index
    %c0_143 = arith.constant 0 : index
    %245 = vector.load %arg16[%c0_142, %c0_143] : memref<50x6xf32, #tpu.memory_space<vmem>>, vector<50x6xf32>
    %cst_144 = arith.constant dense<0.000000e+00> : vector<1x6xf32>
    %246 = tpu.matmul %244, %245, %cst_144 {dimension_numbers = #tpu.dot_dimension_numbers<[1], [0], [0], [1], [0, 0, 1, 1], [], []>} : vector<1x50xf32>, vector<50x6xf32>, vector<1x6xf32> -> vector<1x6xf32>
    %c0_145 = arith.constant 0 : index
    %c0_146 = arith.constant 0 : index
    %247 = vector.load %arg17[%c0_145, %c0_146] : memref<1x6xf32, #tpu.memory_space<vmem>>, vector<1x6xf32>
    %248 = arith.addf %246, %247 : vector<1x6xf32>
    %249 = vector.extract_strided_slice %248 {offsets = [0, 0], sizes = [1, 4], strides = [1, 1]} : vector<1x6xf32> to vector<1x4xf32>
    %250 = vector.extract_strided_slice %248 {offsets = [0, 4], sizes = [1, 1], strides = [1, 1]} : vector<1x6xf32> to vector<1x1xf32>
    %251 = vector.extract_strided_slice %248 {offsets = [0, 5], sizes = [1, 1], strides = [1, 1]} : vector<1x6xf32> to vector<1x1xf32>
    %cst_147 = arith.constant 1.000000e+00 : f32
    %252 = vector.broadcast %cst_147 : f32 to vector<1x4xf32>
    %253 = arith.mulf %249, %252 : vector<1x4xf32>
    %cst_148 = arith.constant dense<0xFF800000> : vector<1xf32>
    %254 = vector.multi_reduction <maximumf>, %253, %cst_148 [1] : vector<1x4xf32> to vector<1xf32>
    %255 = vector.shape_cast %254 : vector<1xf32> to vector<1x1xf32>
    %256 = vector.broadcast %255 : vector<1x1xf32> to vector<1x4xf32>
    %257 = arith.subf %253, %256 : vector<1x4xf32>
    %258 = math.exp %257 : vector<1x4xf32>
    %cst_149 = arith.constant dense<0.000000e+00> : vector<1xf32>
    %259 = vector.multi_reduction <add>, %258, %cst_149 [1] : vector<1x4xf32> to vector<1xf32>
    %260 = vector.shape_cast %259 : vector<1xf32> to vector<1x1xf32>
    %261 = vector.broadcast %260 : vector<1x1xf32> to vector<1x4xf32>
    %262 = arith.divf %258, %261 : vector<1x4xf32>
    %263 = vector.broadcast %262 : vector<1x4xf32> to vector<8x4xf32>
    %264 = arith.mulf %1, %263 : vector<8x4xf32>
    %cst_150 = arith.constant dense<0.000000e+00> : vector<8xf32>
    %265 = vector.multi_reduction <add>, %264, %cst_150 [1] : vector<8x4xf32> to vector<8xf32>
    %266 = vector.shape_cast %265 : vector<8xf32> to vector<8x1xf32>
    %267 = vector.broadcast %250 : vector<1x1xf32> to vector<8x1xf32>
    %268 = arith.addf %266, %267 : vector<8x1xf32>
    %269 = vector.broadcast %251 : vector<1x1xf32> to vector<8x1xf32>
    %270 = arith.mulf %268, %269 : vector<8x1xf32>
    %271 = arith.negf %270 : vector<8x1xf32>
    %272 = math.exp %271 : vector<8x1xf32>
    %cst_151 = arith.constant 1.000000e+00 : f32
    %273 = vector.broadcast %cst_151 : f32 to vector<8x1xf32>
    %274 = arith.addf %273, %272 : vector<8x1xf32>
    %275 = arith.divf %273, %274 : vector<8x1xf32>
    %cst_152 = arith.constant 5.000000e-01 : f32
    %276 = vector.broadcast %cst_152 : f32 to vector<8x1xf32>
    %277 = arith.cmpf ogt, %275, %276 : vector<8x1xf32>
    %278 = arith.extui %277 : vector<8x1xi1> to vector<8x1xi32>
    %279 = arith.sitofp %278 : vector<8x1xi32> to vector<8x1xf32>
    %280 = arith.mulf %97, %279 : vector<8x1xf32>
    %cst_153 = arith.constant 1.000000e+00 : f32
    %281 = vector.broadcast %cst_153 : f32 to vector<8x1xf32>
    %282 = arith.subf %281, %279 : vector<8x1xf32>
    %283 = arith.mulf %97, %282 : vector<8x1xf32>
    %cst_154 = arith.constant dense<0.000000e+00> : vector<1xf32>
    %284 = vector.multi_reduction <add>, %280, %cst_154 [0] : vector<8x1xf32> to vector<1xf32>
    %285 = vector.shape_cast %284 : vector<1xf32> to vector<1x1xf32>
    %cst_155 = arith.constant 0.000000e+00 : f32
    %286 = vector.broadcast %cst_155 : f32 to vector<1x1xf32>
    %287 = arith.cmpf oeq, %285, %286 : vector<1x1xf32>
    %cst_156 = arith.constant dense<0.000000e+00> : vector<1xf32>
    %288 = vector.multi_reduction <add>, %283, %cst_156 [0] : vector<8x1xf32> to vector<1xf32>
    %289 = vector.shape_cast %288 : vector<1xf32> to vector<1x1xf32>
    %cst_157 = arith.constant 0.000000e+00 : f32
    %290 = vector.broadcast %cst_157 : f32 to vector<1x1xf32>
    %291 = arith.cmpf oeq, %289, %290 : vector<1x1xf32>
    %292 = arith.ori %287, %291 : vector<1x1xi1>
    %293 = arith.extui %292 : vector<1x1xi1> to vector<1x1xi32>
    %294 = arith.sitofp %293 : vector<1x1xi32> to vector<1x1xf32>
    %c0_158 = arith.constant 0 : index
    %c0_159 = arith.constant 0 : index
    %295 = vector.load %arg18[%c0_158, %c0_159] : memref<32x10xf32, #tpu.memory_space<vmem>>, vector<32x10xf32>
    %cst_160 = arith.constant dense<0.000000e+00> : vector<1x10xf32>
    %296 = tpu.matmul %235, %295, %cst_160 {dimension_numbers = #tpu.dot_dimension_numbers<[1], [0], [0], [1], [0, 0, 1, 1], [], []>} : vector<1x32xf32>, vector<32x10xf32>, vector<1x10xf32> -> vector<1x10xf32>
    %c0_161 = arith.constant 0 : index
    %c0_162 = arith.constant 0 : index
    %297 = vector.load %arg19[%c0_161, %c0_162] : memref<32x10xf32, #tpu.memory_space<vmem>>, vector<32x10xf32>
    %cst_163 = arith.constant dense<0.000000e+00> : vector<1x10xf32>
    %298 = tpu.matmul %38, %297, %cst_163 {dimension_numbers = #tpu.dot_dimension_numbers<[1], [0], [0], [1], [0, 0, 1, 1], [], []>} : vector<1x32xf32>, vector<32x10xf32>, vector<1x10xf32> -> vector<1x10xf32>
    %299 = arith.addf %296, %298 : vector<1x10xf32>
    %c0_164 = arith.constant 0 : index
    %c0_165 = arith.constant 0 : index
    %300 = vector.load %arg20[%c0_164, %c0_165] : memref<1x10xf32, #tpu.memory_space<vmem>>, vector<1x10xf32>
    %301 = arith.addf %299, %300 : vector<1x10xf32>
    %cst_166 = arith.constant dense<0.000000e+00> : vector<1xf32>
    %302 = vector.multi_reduction <add>, %280, %cst_166 [0] : vector<8x1xf32> to vector<1xf32>
    %303 = vector.shape_cast %302 : vector<1xf32> to vector<1x1xf32>
    %cst_167 = arith.constant 9.99999993E-9 : f32
    %304 = vector.broadcast %cst_167 : f32 to vector<1x1xf32>
    %305 = arith.addf %303, %304 : vector<1x1xf32>
    %306 = vector.broadcast %280 : vector<8x1xf32> to vector<8x32xf32>
    %307 = arith.mulf %34, %306 : vector<8x32xf32>
    %cst_168 = arith.constant dense<0.000000e+00> : vector<32xf32>
    %308 = vector.multi_reduction <add>, %307, %cst_168 [0] : vector<8x32xf32> to vector<32xf32>
    %309 = vector.shape_cast %308 : vector<32xf32> to vector<1x32xf32>
    %310 = vector.broadcast %305 : vector<1x1xf32> to vector<1x32xf32>
    %311 = arith.divf %309, %310 : vector<1x32xf32>
    %c0_169 = arith.constant 0 : index
    %c0_170 = arith.constant 0 : index
    %312 = vector.load %arg18[%c0_169, %c0_170] : memref<32x10xf32, #tpu.memory_space<vmem>>, vector<32x10xf32>
    %cst_171 = arith.constant dense<0.000000e+00> : vector<1x10xf32>
    %313 = tpu.matmul %311, %312, %cst_171 {dimension_numbers = #tpu.dot_dimension_numbers<[1], [0], [0], [1], [0, 0, 1, 1], [], []>} : vector<1x32xf32>, vector<32x10xf32>, vector<1x10xf32> -> vector<1x10xf32>
    %c0_172 = arith.constant 0 : index
    %c0_173 = arith.constant 0 : index
    %314 = vector.load %arg19[%c0_172, %c0_173] : memref<32x10xf32, #tpu.memory_space<vmem>>, vector<32x10xf32>
    %cst_174 = arith.constant dense<0.000000e+00> : vector<1x10xf32>
    %315 = tpu.matmul %38, %314, %cst_174 {dimension_numbers = #tpu.dot_dimension_numbers<[1], [0], [0], [1], [0, 0, 1, 1], [], []>} : vector<1x32xf32>, vector<32x10xf32>, vector<1x10xf32> -> vector<1x10xf32>
    %316 = arith.addf %313, %315 : vector<1x10xf32>
    %c0_175 = arith.constant 0 : index
    %c0_176 = arith.constant 0 : index
    %317 = vector.load %arg20[%c0_175, %c0_176] : memref<1x10xf32, #tpu.memory_space<vmem>>, vector<1x10xf32>
    %318 = arith.addf %316, %317 : vector<1x10xf32>
    %cst_177 = arith.constant dense<0.000000e+00> : vector<1xf32>
    %319 = vector.multi_reduction <add>, %283, %cst_177 [0] : vector<8x1xf32> to vector<1xf32>
    %320 = vector.shape_cast %319 : vector<1xf32> to vector<1x1xf32>
    %cst_178 = arith.constant 9.99999993E-9 : f32
    %321 = vector.broadcast %cst_178 : f32 to vector<1x1xf32>
    %322 = arith.addf %320, %321 : vector<1x1xf32>
    %323 = vector.broadcast %283 : vector<8x1xf32> to vector<8x32xf32>
    %324 = arith.mulf %34, %323 : vector<8x32xf32>
    %cst_179 = arith.constant dense<0.000000e+00> : vector<32xf32>
    %325 = vector.multi_reduction <add>, %324, %cst_179 [0] : vector<8x32xf32> to vector<32xf32>
    %326 = vector.shape_cast %325 : vector<32xf32> to vector<1x32xf32>
    %327 = vector.broadcast %322 : vector<1x1xf32> to vector<1x32xf32>
    %328 = arith.divf %326, %327 : vector<1x32xf32>
    %c0_180 = arith.constant 0 : index
    %c0_181 = arith.constant 0 : index
    %329 = vector.load %arg18[%c0_180, %c0_181] : memref<32x10xf32, #tpu.memory_space<vmem>>, vector<32x10xf32>
    %cst_182 = arith.constant dense<0.000000e+00> : vector<1x10xf32>
    %330 = tpu.matmul %328, %329, %cst_182 {dimension_numbers = #tpu.dot_dimension_numbers<[1], [0], [0], [1], [0, 0, 1, 1], [], []>} : vector<1x32xf32>, vector<32x10xf32>, vector<1x10xf32> -> vector<1x10xf32>
    %c0_183 = arith.constant 0 : index
    %c0_184 = arith.constant 0 : index
    %331 = vector.load %arg19[%c0_183, %c0_184] : memref<32x10xf32, #tpu.memory_space<vmem>>, vector<32x10xf32>
    %cst_185 = arith.constant dense<0.000000e+00> : vector<1x10xf32>
    %332 = tpu.matmul %38, %331, %cst_185 {dimension_numbers = #tpu.dot_dimension_numbers<[1], [0], [0], [1], [0, 0, 1, 1], [], []>} : vector<1x32xf32>, vector<32x10xf32>, vector<1x10xf32> -> vector<1x10xf32>
    %333 = arith.addf %330, %332 : vector<1x10xf32>
    %c0_186 = arith.constant 0 : index
    %c0_187 = arith.constant 0 : index
    %334 = vector.load %arg20[%c0_186, %c0_187] : memref<1x10xf32, #tpu.memory_space<vmem>>, vector<1x10xf32>
    %335 = arith.addf %333, %334 : vector<1x10xf32>
    %336 = vector.extract_strided_slice %115 {offsets = [0, 8], sizes = [1, 2], strides = [1, 1]} : vector<1x10xf32> to vector<1x2xf32>
    %337 = vector.extract_strided_slice %115 {offsets = [0, 0], sizes = [1, 4], strides = [1, 1]} : vector<1x10xf32> to vector<1x4xf32>
    %338 = vector.broadcast %337 : vector<1x4xf32> to vector<8x4xf32>
    %339 = arith.mulf %5, %338 : vector<8x4xf32>
    %cst_188 = arith.constant dense<0.000000e+00> : vector<8xf32>
    %340 = vector.multi_reduction <add>, %339, %cst_188 [1] : vector<8x4xf32> to vector<8xf32>
    %341 = vector.shape_cast %340 : vector<8xf32> to vector<8x1xf32>
    %342 = tpu.iota {dimensions = array<i32: 1>} : vector<1x2xi32>
    %c0_i32 = arith.constant 0 : i32
    %343 = vector.broadcast %c0_i32 : i32 to vector<1x2xi32>
    %344 = arith.cmpi eq, %342, %343 : vector<1x2xi32>
    %345 = arith.extui %344 : vector<1x2xi1> to vector<1x2xi32>
    %346 = arith.sitofp %345 : vector<1x2xi32> to vector<1x2xf32>
    %347 = vector.broadcast %341 : vector<8x1xf32> to vector<8x2xf32>
    %348 = vector.broadcast %346 : vector<1x2xf32> to vector<8x2xf32>
    %349 = arith.mulf %347, %348 : vector<8x2xf32>
    %350 = vector.broadcast %336 : vector<1x2xf32> to vector<8x2xf32>
    %351 = arith.addf %350, %349 : vector<8x2xf32>
    %352 = vector.extract_strided_slice %115 {offsets = [0, 4], sizes = [1, 4], strides = [1, 1]} : vector<1x10xf32> to vector<1x4xf32>
    %353 = vector.broadcast %352 : vector<1x4xf32> to vector<8x4xf32>
    %354 = arith.mulf %5, %353 : vector<8x4xf32>
    %cst_189 = arith.constant dense<0.000000e+00> : vector<8xf32>
    %355 = vector.multi_reduction <add>, %354, %cst_189 [1] : vector<8x4xf32> to vector<8xf32>
    %356 = vector.shape_cast %355 : vector<8xf32> to vector<8x1xf32>
    %357 = tpu.iota {dimensions = array<i32: 1>} : vector<1x2xi32>
    %c1_i32 = arith.constant 1 : i32
    %358 = vector.broadcast %c1_i32 : i32 to vector<1x2xi32>
    %359 = arith.cmpi eq, %357, %358 : vector<1x2xi32>
    %360 = arith.extui %359 : vector<1x2xi1> to vector<1x2xi32>
    %361 = arith.sitofp %360 : vector<1x2xi32> to vector<1x2xf32>
    %362 = vector.broadcast %356 : vector<8x1xf32> to vector<8x2xf32>
    %363 = vector.broadcast %361 : vector<1x2xf32> to vector<8x2xf32>
    %364 = arith.mulf %362, %363 : vector<8x2xf32>
    %365 = arith.addf %351, %364 : vector<8x2xf32>
    %366 = vector.extract_strided_slice %191 {offsets = [0, 8], sizes = [1, 2], strides = [1, 1]} : vector<1x10xf32> to vector<1x2xf32>
    %367 = vector.extract_strided_slice %191 {offsets = [0, 0], sizes = [1, 4], strides = [1, 1]} : vector<1x10xf32> to vector<1x4xf32>
    %368 = vector.broadcast %367 : vector<1x4xf32> to vector<8x4xf32>
    %369 = arith.mulf %5, %368 : vector<8x4xf32>
    %cst_190 = arith.constant dense<0.000000e+00> : vector<8xf32>
    %370 = vector.multi_reduction <add>, %369, %cst_190 [1] : vector<8x4xf32> to vector<8xf32>
    %371 = vector.shape_cast %370 : vector<8xf32> to vector<8x1xf32>
    %372 = tpu.iota {dimensions = array<i32: 1>} : vector<1x2xi32>
    %c0_i32_191 = arith.constant 0 : i32
    %373 = vector.broadcast %c0_i32_191 : i32 to vector<1x2xi32>
    %374 = arith.cmpi eq, %372, %373 : vector<1x2xi32>
    %375 = arith.extui %374 : vector<1x2xi1> to vector<1x2xi32>
    %376 = arith.sitofp %375 : vector<1x2xi32> to vector<1x2xf32>
    %377 = vector.broadcast %371 : vector<8x1xf32> to vector<8x2xf32>
    %378 = vector.broadcast %376 : vector<1x2xf32> to vector<8x2xf32>
    %379 = arith.mulf %377, %378 : vector<8x2xf32>
    %380 = vector.broadcast %366 : vector<1x2xf32> to vector<8x2xf32>
    %381 = arith.addf %380, %379 : vector<8x2xf32>
    %382 = vector.extract_strided_slice %191 {offsets = [0, 4], sizes = [1, 4], strides = [1, 1]} : vector<1x10xf32> to vector<1x4xf32>
    %383 = vector.broadcast %382 : vector<1x4xf32> to vector<8x4xf32>
    %384 = arith.mulf %5, %383 : vector<8x4xf32>
    %cst_192 = arith.constant dense<0.000000e+00> : vector<8xf32>
    %385 = vector.multi_reduction <add>, %384, %cst_192 [1] : vector<8x4xf32> to vector<8xf32>
    %386 = vector.shape_cast %385 : vector<8xf32> to vector<8x1xf32>
    %387 = tpu.iota {dimensions = array<i32: 1>} : vector<1x2xi32>
    %c1_i32_193 = arith.constant 1 : i32
    %388 = vector.broadcast %c1_i32_193 : i32 to vector<1x2xi32>
    %389 = arith.cmpi eq, %387, %388 : vector<1x2xi32>
    %390 = arith.extui %389 : vector<1x2xi1> to vector<1x2xi32>
    %391 = arith.sitofp %390 : vector<1x2xi32> to vector<1x2xf32>
    %392 = vector.broadcast %386 : vector<8x1xf32> to vector<8x2xf32>
    %393 = vector.broadcast %391 : vector<1x2xf32> to vector<8x2xf32>
    %394 = arith.mulf %392, %393 : vector<8x2xf32>
    %395 = arith.addf %381, %394 : vector<8x2xf32>
    %396 = vector.extract_strided_slice %208 {offsets = [0, 8], sizes = [1, 2], strides = [1, 1]} : vector<1x10xf32> to vector<1x2xf32>
    %397 = vector.extract_strided_slice %208 {offsets = [0, 0], sizes = [1, 4], strides = [1, 1]} : vector<1x10xf32> to vector<1x4xf32>
    %398 = vector.broadcast %397 : vector<1x4xf32> to vector<8x4xf32>
    %399 = arith.mulf %5, %398 : vector<8x4xf32>
    %cst_194 = arith.constant dense<0.000000e+00> : vector<8xf32>
    %400 = vector.multi_reduction <add>, %399, %cst_194 [1] : vector<8x4xf32> to vector<8xf32>
    %401 = vector.shape_cast %400 : vector<8xf32> to vector<8x1xf32>
    %402 = tpu.iota {dimensions = array<i32: 1>} : vector<1x2xi32>
    %c0_i32_195 = arith.constant 0 : i32
    %403 = vector.broadcast %c0_i32_195 : i32 to vector<1x2xi32>
    %404 = arith.cmpi eq, %402, %403 : vector<1x2xi32>
    %405 = arith.extui %404 : vector<1x2xi1> to vector<1x2xi32>
    %406 = arith.sitofp %405 : vector<1x2xi32> to vector<1x2xf32>
    %407 = vector.broadcast %401 : vector<8x1xf32> to vector<8x2xf32>
    %408 = vector.broadcast %406 : vector<1x2xf32> to vector<8x2xf32>
    %409 = arith.mulf %407, %408 : vector<8x2xf32>
    %410 = vector.broadcast %396 : vector<1x2xf32> to vector<8x2xf32>
    %411 = arith.addf %410, %409 : vector<8x2xf32>
    %412 = vector.extract_strided_slice %208 {offsets = [0, 4], sizes = [1, 4], strides = [1, 1]} : vector<1x10xf32> to vector<1x4xf32>
    %413 = vector.broadcast %412 : vector<1x4xf32> to vector<8x4xf32>
    %414 = arith.mulf %5, %413 : vector<8x4xf32>
    %cst_196 = arith.constant dense<0.000000e+00> : vector<8xf32>
    %415 = vector.multi_reduction <add>, %414, %cst_196 [1] : vector<8x4xf32> to vector<8xf32>
    %416 = vector.shape_cast %415 : vector<8xf32> to vector<8x1xf32>
    %417 = tpu.iota {dimensions = array<i32: 1>} : vector<1x2xi32>
    %c1_i32_197 = arith.constant 1 : i32
    %418 = vector.broadcast %c1_i32_197 : i32 to vector<1x2xi32>
    %419 = arith.cmpi eq, %417, %418 : vector<1x2xi32>
    %420 = arith.extui %419 : vector<1x2xi1> to vector<1x2xi32>
    %421 = arith.sitofp %420 : vector<1x2xi32> to vector<1x2xf32>
    %422 = vector.broadcast %416 : vector<8x1xf32> to vector<8x2xf32>
    %423 = vector.broadcast %421 : vector<1x2xf32> to vector<8x2xf32>
    %424 = arith.mulf %422, %423 : vector<8x2xf32>
    %425 = arith.addf %411, %424 : vector<8x2xf32>
    %426 = vector.extract_strided_slice %225 {offsets = [0, 8], sizes = [1, 2], strides = [1, 1]} : vector<1x10xf32> to vector<1x2xf32>
    %427 = vector.extract_strided_slice %225 {offsets = [0, 0], sizes = [1, 4], strides = [1, 1]} : vector<1x10xf32> to vector<1x4xf32>
    %428 = vector.broadcast %427 : vector<1x4xf32> to vector<8x4xf32>
    %429 = arith.mulf %5, %428 : vector<8x4xf32>
    %cst_198 = arith.constant dense<0.000000e+00> : vector<8xf32>
    %430 = vector.multi_reduction <add>, %429, %cst_198 [1] : vector<8x4xf32> to vector<8xf32>
    %431 = vector.shape_cast %430 : vector<8xf32> to vector<8x1xf32>
    %432 = tpu.iota {dimensions = array<i32: 1>} : vector<1x2xi32>
    %c0_i32_199 = arith.constant 0 : i32
    %433 = vector.broadcast %c0_i32_199 : i32 to vector<1x2xi32>
    %434 = arith.cmpi eq, %432, %433 : vector<1x2xi32>
    %435 = arith.extui %434 : vector<1x2xi1> to vector<1x2xi32>
    %436 = arith.sitofp %435 : vector<1x2xi32> to vector<1x2xf32>
    %437 = vector.broadcast %431 : vector<8x1xf32> to vector<8x2xf32>
    %438 = vector.broadcast %436 : vector<1x2xf32> to vector<8x2xf32>
    %439 = arith.mulf %437, %438 : vector<8x2xf32>
    %440 = vector.broadcast %426 : vector<1x2xf32> to vector<8x2xf32>
    %441 = arith.addf %440, %439 : vector<8x2xf32>
    %442 = vector.extract_strided_slice %225 {offsets = [0, 4], sizes = [1, 4], strides = [1, 1]} : vector<1x10xf32> to vector<1x4xf32>
    %443 = vector.broadcast %442 : vector<1x4xf32> to vector<8x4xf32>
    %444 = arith.mulf %5, %443 : vector<8x4xf32>
    %cst_200 = arith.constant dense<0.000000e+00> : vector<8xf32>
    %445 = vector.multi_reduction <add>, %444, %cst_200 [1] : vector<8x4xf32> to vector<8xf32>
    %446 = vector.shape_cast %445 : vector<8xf32> to vector<8x1xf32>
    %447 = tpu.iota {dimensions = array<i32: 1>} : vector<1x2xi32>
    %c1_i32_201 = arith.constant 1 : i32
    %448 = vector.broadcast %c1_i32_201 : i32 to vector<1x2xi32>
    %449 = arith.cmpi eq, %447, %448 : vector<1x2xi32>
    %450 = arith.extui %449 : vector<1x2xi1> to vector<1x2xi32>
    %451 = arith.sitofp %450 : vector<1x2xi32> to vector<1x2xf32>
    %452 = vector.broadcast %446 : vector<8x1xf32> to vector<8x2xf32>
    %453 = vector.broadcast %451 : vector<1x2xf32> to vector<8x2xf32>
    %454 = arith.mulf %452, %453 : vector<8x2xf32>
    %455 = arith.addf %441, %454 : vector<8x2xf32>
    %456 = vector.broadcast %152 : vector<1x4xf32> to vector<8x4xf32>
    %457 = arith.mulf %5, %456 : vector<8x4xf32>
    %cst_202 = arith.constant dense<0.000000e+00> : vector<8xf32>
    %458 = vector.multi_reduction <add>, %457, %cst_202 [1] : vector<8x4xf32> to vector<8xf32>
    %459 = vector.shape_cast %458 : vector<8xf32> to vector<8x1xf32>
    %460 = vector.broadcast %140 : vector<1x1xf32> to vector<8x1xf32>
    %461 = arith.addf %459, %460 : vector<8x1xf32>
    %462 = vector.broadcast %141 : vector<1x1xf32> to vector<8x1xf32>
    %463 = arith.mulf %461, %462 : vector<8x1xf32>
    %464 = arith.negf %463 : vector<8x1xf32>
    %465 = math.exp %464 : vector<8x1xf32>
    %cst_203 = arith.constant 1.000000e+00 : f32
    %466 = vector.broadcast %cst_203 : f32 to vector<8x1xf32>
    %467 = arith.addf %466, %465 : vector<8x1xf32>
    %468 = arith.divf %466, %467 : vector<8x1xf32>
    %cst_204 = arith.constant 1.000000e+00 : f32
    %469 = vector.broadcast %cst_204 : f32 to vector<8x1xf32>
    %470 = arith.subf %469, %468 : vector<8x1xf32>
    %471 = vector.broadcast %470 : vector<8x1xf32> to vector<8x2xf32>
    %472 = arith.mulf %471, %455 : vector<8x2xf32>
    %473 = vector.broadcast %468 : vector<8x1xf32> to vector<8x2xf32>
    %474 = arith.mulf %473, %425 : vector<8x2xf32>
    %475 = arith.addf %472, %474 : vector<8x2xf32>
    %476 = vector.broadcast %184 : vector<1x1xf32> to vector<8x2xf32>
    %477 = arith.mulf %476, %395 : vector<8x2xf32>
    %cst_205 = arith.constant 1.000000e+00 : f32
    %478 = vector.broadcast %cst_205 : f32 to vector<1x1xf32>
    %479 = arith.subf %478, %184 : vector<1x1xf32>
    %480 = vector.broadcast %479 : vector<1x1xf32> to vector<8x2xf32>
    %481 = arith.mulf %480, %475 : vector<8x2xf32>
    %482 = arith.addf %477, %481 : vector<8x2xf32>
    %483 = vector.extract_strided_slice %301 {offsets = [0, 8], sizes = [1, 2], strides = [1, 1]} : vector<1x10xf32> to vector<1x2xf32>
    %484 = vector.extract_strided_slice %301 {offsets = [0, 0], sizes = [1, 4], strides = [1, 1]} : vector<1x10xf32> to vector<1x4xf32>
    %485 = vector.broadcast %484 : vector<1x4xf32> to vector<8x4xf32>
    %486 = arith.mulf %5, %485 : vector<8x4xf32>
    %cst_206 = arith.constant dense<0.000000e+00> : vector<8xf32>
    %487 = vector.multi_reduction <add>, %486, %cst_206 [1] : vector<8x4xf32> to vector<8xf32>
    %488 = vector.shape_cast %487 : vector<8xf32> to vector<8x1xf32>
    %489 = tpu.iota {dimensions = array<i32: 1>} : vector<1x2xi32>
    %c0_i32_207 = arith.constant 0 : i32
    %490 = vector.broadcast %c0_i32_207 : i32 to vector<1x2xi32>
    %491 = arith.cmpi eq, %489, %490 : vector<1x2xi32>
    %492 = arith.extui %491 : vector<1x2xi1> to vector<1x2xi32>
    %493 = arith.sitofp %492 : vector<1x2xi32> to vector<1x2xf32>
    %494 = vector.broadcast %488 : vector<8x1xf32> to vector<8x2xf32>
    %495 = vector.broadcast %493 : vector<1x2xf32> to vector<8x2xf32>
    %496 = arith.mulf %494, %495 : vector<8x2xf32>
    %497 = vector.broadcast %483 : vector<1x2xf32> to vector<8x2xf32>
    %498 = arith.addf %497, %496 : vector<8x2xf32>
    %499 = vector.extract_strided_slice %301 {offsets = [0, 4], sizes = [1, 4], strides = [1, 1]} : vector<1x10xf32> to vector<1x4xf32>
    %500 = vector.broadcast %499 : vector<1x4xf32> to vector<8x4xf32>
    %501 = arith.mulf %5, %500 : vector<8x4xf32>
    %cst_208 = arith.constant dense<0.000000e+00> : vector<8xf32>
    %502 = vector.multi_reduction <add>, %501, %cst_208 [1] : vector<8x4xf32> to vector<8xf32>
    %503 = vector.shape_cast %502 : vector<8xf32> to vector<8x1xf32>
    %504 = tpu.iota {dimensions = array<i32: 1>} : vector<1x2xi32>
    %c1_i32_209 = arith.constant 1 : i32
    %505 = vector.broadcast %c1_i32_209 : i32 to vector<1x2xi32>
    %506 = arith.cmpi eq, %504, %505 : vector<1x2xi32>
    %507 = arith.extui %506 : vector<1x2xi1> to vector<1x2xi32>
    %508 = arith.sitofp %507 : vector<1x2xi32> to vector<1x2xf32>
    %509 = vector.broadcast %503 : vector<8x1xf32> to vector<8x2xf32>
    %510 = vector.broadcast %508 : vector<1x2xf32> to vector<8x2xf32>
    %511 = arith.mulf %509, %510 : vector<8x2xf32>
    %512 = arith.addf %498, %511 : vector<8x2xf32>
    %513 = vector.extract_strided_slice %318 {offsets = [0, 8], sizes = [1, 2], strides = [1, 1]} : vector<1x10xf32> to vector<1x2xf32>
    %514 = vector.extract_strided_slice %318 {offsets = [0, 0], sizes = [1, 4], strides = [1, 1]} : vector<1x10xf32> to vector<1x4xf32>
    %515 = vector.broadcast %514 : vector<1x4xf32> to vector<8x4xf32>
    %516 = arith.mulf %5, %515 : vector<8x4xf32>
    %cst_210 = arith.constant dense<0.000000e+00> : vector<8xf32>
    %517 = vector.multi_reduction <add>, %516, %cst_210 [1] : vector<8x4xf32> to vector<8xf32>
    %518 = vector.shape_cast %517 : vector<8xf32> to vector<8x1xf32>
    %519 = tpu.iota {dimensions = array<i32: 1>} : vector<1x2xi32>
    %c0_i32_211 = arith.constant 0 : i32
    %520 = vector.broadcast %c0_i32_211 : i32 to vector<1x2xi32>
    %521 = arith.cmpi eq, %519, %520 : vector<1x2xi32>
    %522 = arith.extui %521 : vector<1x2xi1> to vector<1x2xi32>
    %523 = arith.sitofp %522 : vector<1x2xi32> to vector<1x2xf32>
    %524 = vector.broadcast %518 : vector<8x1xf32> to vector<8x2xf32>
    %525 = vector.broadcast %523 : vector<1x2xf32> to vector<8x2xf32>
    %526 = arith.mulf %524, %525 : vector<8x2xf32>
    %527 = vector.broadcast %513 : vector<1x2xf32> to vector<8x2xf32>
    %528 = arith.addf %527, %526 : vector<8x2xf32>
    %529 = vector.extract_strided_slice %318 {offsets = [0, 4], sizes = [1, 4], strides = [1, 1]} : vector<1x10xf32> to vector<1x4xf32>
    %530 = vector.broadcast %529 : vector<1x4xf32> to vector<8x4xf32>
    %531 = arith.mulf %5, %530 : vector<8x4xf32>
    %cst_212 = arith.constant dense<0.000000e+00> : vector<8xf32>
    %532 = vector.multi_reduction <add>, %531, %cst_212 [1] : vector<8x4xf32> to vector<8xf32>
    %533 = vector.shape_cast %532 : vector<8xf32> to vector<8x1xf32>
    %534 = tpu.iota {dimensions = array<i32: 1>} : vector<1x2xi32>
    %c1_i32_213 = arith.constant 1 : i32
    %535 = vector.broadcast %c1_i32_213 : i32 to vector<1x2xi32>
    %536 = arith.cmpi eq, %534, %535 : vector<1x2xi32>
    %537 = arith.extui %536 : vector<1x2xi1> to vector<1x2xi32>
    %538 = arith.sitofp %537 : vector<1x2xi32> to vector<1x2xf32>
    %539 = vector.broadcast %533 : vector<8x1xf32> to vector<8x2xf32>
    %540 = vector.broadcast %538 : vector<1x2xf32> to vector<8x2xf32>
    %541 = arith.mulf %539, %540 : vector<8x2xf32>
    %542 = arith.addf %528, %541 : vector<8x2xf32>
    %543 = vector.extract_strided_slice %335 {offsets = [0, 8], sizes = [1, 2], strides = [1, 1]} : vector<1x10xf32> to vector<1x2xf32>
    %544 = vector.extract_strided_slice %335 {offsets = [0, 0], sizes = [1, 4], strides = [1, 1]} : vector<1x10xf32> to vector<1x4xf32>
    %545 = vector.broadcast %544 : vector<1x4xf32> to vector<8x4xf32>
    %546 = arith.mulf %5, %545 : vector<8x4xf32>
    %cst_214 = arith.constant dense<0.000000e+00> : vector<8xf32>
    %547 = vector.multi_reduction <add>, %546, %cst_214 [1] : vector<8x4xf32> to vector<8xf32>
    %548 = vector.shape_cast %547 : vector<8xf32> to vector<8x1xf32>
    %549 = tpu.iota {dimensions = array<i32: 1>} : vector<1x2xi32>
    %c0_i32_215 = arith.constant 0 : i32
    %550 = vector.broadcast %c0_i32_215 : i32 to vector<1x2xi32>
    %551 = arith.cmpi eq, %549, %550 : vector<1x2xi32>
    %552 = arith.extui %551 : vector<1x2xi1> to vector<1x2xi32>
    %553 = arith.sitofp %552 : vector<1x2xi32> to vector<1x2xf32>
    %554 = vector.broadcast %548 : vector<8x1xf32> to vector<8x2xf32>
    %555 = vector.broadcast %553 : vector<1x2xf32> to vector<8x2xf32>
    %556 = arith.mulf %554, %555 : vector<8x2xf32>
    %557 = vector.broadcast %543 : vector<1x2xf32> to vector<8x2xf32>
    %558 = arith.addf %557, %556 : vector<8x2xf32>
    %559 = vector.extract_strided_slice %335 {offsets = [0, 4], sizes = [1, 4], strides = [1, 1]} : vector<1x10xf32> to vector<1x4xf32>
    %560 = vector.broadcast %559 : vector<1x4xf32> to vector<8x4xf32>
    %561 = arith.mulf %5, %560 : vector<8x4xf32>
    %cst_216 = arith.constant dense<0.000000e+00> : vector<8xf32>
    %562 = vector.multi_reduction <add>, %561, %cst_216 [1] : vector<8x4xf32> to vector<8xf32>
    %563 = vector.shape_cast %562 : vector<8xf32> to vector<8x1xf32>
    %564 = tpu.iota {dimensions = array<i32: 1>} : vector<1x2xi32>
    %c1_i32_217 = arith.constant 1 : i32
    %565 = vector.broadcast %c1_i32_217 : i32 to vector<1x2xi32>
    %566 = arith.cmpi eq, %564, %565 : vector<1x2xi32>
    %567 = arith.extui %566 : vector<1x2xi1> to vector<1x2xi32>
    %568 = arith.sitofp %567 : vector<1x2xi32> to vector<1x2xf32>
    %569 = vector.broadcast %563 : vector<8x1xf32> to vector<8x2xf32>
    %570 = vector.broadcast %568 : vector<1x2xf32> to vector<8x2xf32>
    %571 = arith.mulf %569, %570 : vector<8x2xf32>
    %572 = arith.addf %558, %571 : vector<8x2xf32>
    %573 = vector.broadcast %262 : vector<1x4xf32> to vector<8x4xf32>
    %574 = arith.mulf %5, %573 : vector<8x4xf32>
    %cst_218 = arith.constant dense<0.000000e+00> : vector<8xf32>
    %575 = vector.multi_reduction <add>, %574, %cst_218 [1] : vector<8x4xf32> to vector<8xf32>
    %576 = vector.shape_cast %575 : vector<8xf32> to vector<8x1xf32>
    %577 = vector.broadcast %250 : vector<1x1xf32> to vector<8x1xf32>
    %578 = arith.addf %576, %577 : vector<8x1xf32>
    %579 = vector.broadcast %251 : vector<1x1xf32> to vector<8x1xf32>
    %580 = arith.mulf %578, %579 : vector<8x1xf32>
    %581 = arith.negf %580 : vector<8x1xf32>
    %582 = math.exp %581 : vector<8x1xf32>
    %cst_219 = arith.constant 1.000000e+00 : f32
    %583 = vector.broadcast %cst_219 : f32 to vector<8x1xf32>
    %584 = arith.addf %583, %582 : vector<8x1xf32>
    %585 = arith.divf %583, %584 : vector<8x1xf32>
    %cst_220 = arith.constant 1.000000e+00 : f32
    %586 = vector.broadcast %cst_220 : f32 to vector<8x1xf32>
    %587 = arith.subf %586, %585 : vector<8x1xf32>
    %588 = vector.broadcast %587 : vector<8x1xf32> to vector<8x2xf32>
    %589 = arith.mulf %588, %572 : vector<8x2xf32>
    %590 = vector.broadcast %585 : vector<8x1xf32> to vector<8x2xf32>
    %591 = arith.mulf %590, %542 : vector<8x2xf32>
    %592 = arith.addf %589, %591 : vector<8x2xf32>
    %593 = vector.broadcast %294 : vector<1x1xf32> to vector<8x2xf32>
    %594 = arith.mulf %593, %512 : vector<8x2xf32>
    %cst_221 = arith.constant 1.000000e+00 : f32
    %595 = vector.broadcast %cst_221 : f32 to vector<1x1xf32>
    %596 = arith.subf %595, %294 : vector<1x1xf32>
    %597 = vector.broadcast %596 : vector<1x1xf32> to vector<8x2xf32>
    %598 = arith.mulf %597, %592 : vector<8x2xf32>
    %599 = arith.addf %594, %598 : vector<8x2xf32>
    %600 = vector.broadcast %76 : vector<1x4xf32> to vector<8x4xf32>
    %601 = arith.mulf %5, %600 : vector<8x4xf32>
    %cst_222 = arith.constant dense<0.000000e+00> : vector<8xf32>
    %602 = vector.multi_reduction <add>, %601, %cst_222 [1] : vector<8x4xf32> to vector<8xf32>
    %603 = vector.shape_cast %602 : vector<8xf32> to vector<8x1xf32>
    %604 = vector.broadcast %64 : vector<1x1xf32> to vector<8x1xf32>
    %605 = arith.addf %603, %604 : vector<8x1xf32>
    %606 = vector.broadcast %65 : vector<1x1xf32> to vector<8x1xf32>
    %607 = arith.mulf %605, %606 : vector<8x1xf32>
    %608 = arith.negf %607 : vector<8x1xf32>
    %609 = math.exp %608 : vector<8x1xf32>
    %cst_223 = arith.constant 1.000000e+00 : f32
    %610 = vector.broadcast %cst_223 : f32 to vector<8x1xf32>
    %611 = arith.addf %610, %609 : vector<8x1xf32>
    %612 = arith.divf %610, %611 : vector<8x1xf32>
    %cst_224 = arith.constant 1.000000e+00 : f32
    %613 = vector.broadcast %cst_224 : f32 to vector<8x1xf32>
    %614 = arith.subf %613, %612 : vector<8x1xf32>
    %615 = vector.broadcast %614 : vector<8x1xf32> to vector<8x2xf32>
    %616 = arith.mulf %615, %599 : vector<8x2xf32>
    %617 = vector.broadcast %612 : vector<8x1xf32> to vector<8x2xf32>
    %618 = arith.mulf %617, %482 : vector<8x2xf32>
    %619 = arith.addf %616, %618 : vector<8x2xf32>
    %620 = vector.broadcast %108 : vector<1x1xf32> to vector<8x2xf32>
    %621 = arith.mulf %620, %365 : vector<8x2xf32>
    %cst_225 = arith.constant 1.000000e+00 : f32
    %622 = vector.broadcast %cst_225 : f32 to vector<1x1xf32>
    %623 = arith.subf %622, %108 : vector<1x1xf32>
    %624 = vector.broadcast %623 : vector<1x1xf32> to vector<8x2xf32>
    %625 = arith.mulf %624, %619 : vector<8x2xf32>
    %626 = arith.addf %621, %625 : vector<8x2xf32>
    %c0_226 = arith.constant 0 : index
    %c0_227 = arith.constant 0 : index
    %c0_228 = arith.constant 0 : index
    %627 = vector.load %arg21[%c0_226, %c0_227, %c0_228] : memref<1x8x2xf32, #tpu.memory_space<vmem>>, vector<1x8x2xf32>
    %628 = vector.shape_cast %627 : vector<1x8x2xf32> to vector<8x2xf32>
    %629 = vector.shape_cast %626 : vector<8x2xf32> to vector<1x8x2xf32>
    tpu.vector_store %arg21[%c0_226, %c0_227, %c0_228], %629 {strides = array<i32>} : memref<1x8x2xf32, #tpu.memory_space<vmem>>, vector<1x8x2xf32>,
    return
  }
  func.func @transform_0(%arg0: i32) -> (i32, i32, i32) {
    %c0_i32 = arith.constant 0 : i32
    %c0_i32_0 = arith.constant 0 : i32
    %c0_i32_1 = arith.constant 0 : i32
    return %arg0, %c0_i32, %c0_i32_0 : i32, i32, i32
  }
  func.func @transform_1(%arg0: i32) -> (i32, i32, i32) {
    %c0_i32 = arith.constant 0 : i32
    %c0_i32_0 = arith.constant 0 : i32
    %c0_i32_1 = arith.constant 0 : i32
    return %arg0, %c0_i32, %c0_i32_0 : i32, i32, i32
  }
  func.func @transform_2(%arg0: i32) -> (i32, i32, i32) {
    %c0_i32 = arith.constant 0 : i32
    %c0_i32_0 = arith.constant 0 : i32
    %c0_i32_1 = arith.constant 0 : i32
    return %arg0, %c0_i32, %c0_i32_0 : i32, i32, i32
  }
  func.func @transform_3(%arg0: i32) -> (i32, i32) {
    %c0_i32 = arith.constant 0 : i32
    %c0_i32_0 = arith.constant 0 : i32
    %c0_i32_1 = arith.constant 0 : i32
    return %c0_i32, %c0_i32_0 : i32, i32
  }
  func.func @transform_4(%arg0: i32) -> (i32, i32) {
    %c0_i32 = arith.constant 0 : i32
    %c0_i32_0 = arith.constant 0 : i32
    %c0_i32_1 = arith.constant 0 : i32
    return %c0_i32, %c0_i32_0 : i32, i32
  }
  func.func @transform_5(%arg0: i32) -> (i32, i32) {
    %c0_i32 = arith.constant 0 : i32
    %c0_i32_0 = arith.constant 0 : i32
    %c0_i32_1 = arith.constant 0 : i32
    return %c0_i32, %c0_i32_0 : i32, i32
  }
  func.func @transform_6(%arg0: i32) -> (i32, i32) {
    %c0_i32 = arith.constant 0 : i32
    %c0_i32_0 = arith.constant 0 : i32
    %c0_i32_1 = arith.constant 0 : i32
    return %c0_i32, %c0_i32_0 : i32, i32
  }
  func.func @transform_7(%arg0: i32) -> (i32, i32) {
    %c0_i32 = arith.constant 0 : i32
    %c0_i32_0 = arith.constant 0 : i32
    %c0_i32_1 = arith.constant 0 : i32
    return %c0_i32, %c0_i32_0 : i32, i32
  }
  func.func @transform_8(%arg0: i32) -> (i32, i32) {
    %c0_i32 = arith.constant 0 : i32
    %c0_i32_0 = arith.constant 0 : i32
    %c0_i32_1 = arith.constant 0 : i32
    return %c0_i32, %c0_i32_0 : i32, i32
  }
  func.func @transform_9(%arg0: i32) -> (i32, i32) {
    %c0_i32 = arith.constant 0 : i32
    %c0_i32_0 = arith.constant 0 : i32
    %c0_i32_1 = arith.constant 0 : i32
    return %c0_i32, %c0_i32_0 : i32, i32
  }
  func.func @transform_10(%arg0: i32) -> (i32, i32) {
    %c0_i32 = arith.constant 0 : i32
    %c0_i32_0 = arith.constant 0 : i32
    %c0_i32_1 = arith.constant 0 : i32
    return %c0_i32, %c0_i32_0 : i32, i32
  }
  func.func @transform_11(%arg0: i32) -> (i32, i32) {
    %c0_i32 = arith.constant 0 : i32
    %c0_i32_0 = arith.constant 0 : i32
    %c0_i32_1 = arith.constant 0 : i32
    return %c0_i32, %c0_i32_0 : i32, i32
  }
  func.func @transform_12(%arg0: i32) -> (i32, i32) {
    %c0_i32 = arith.constant 0 : i32
    %c0_i32_0 = arith.constant 0 : i32
    %c0_i32_1 = arith.constant 0 : i32
    return %c0_i32, %c0_i32_0 : i32, i32
  }
  func.func @transform_13(%arg0: i32) -> (i32, i32) {
    %c0_i32 = arith.constant 0 : i32
    %c0_i32_0 = arith.constant 0 : i32
    %c0_i32_1 = arith.constant 0 : i32
    return %c0_i32, %c0_i32_0 : i32, i32
  }
  func.func @transform_14(%arg0: i32) -> (i32, i32) {
    %c0_i32 = arith.constant 0 : i32
    %c0_i32_0 = arith.constant 0 : i32
    %c0_i32_1 = arith.constant 0 : i32
    return %c0_i32, %c0_i32_0 : i32, i32
  }
  func.func @transform_15(%arg0: i32) -> (i32, i32) {
    %c0_i32 = arith.constant 0 : i32
    %c0_i32_0 = arith.constant 0 : i32
    %c0_i32_1 = arith.constant 0 : i32
    return %c0_i32, %c0_i32_0 : i32, i32
  }
  func.func @transform_16(%arg0: i32) -> (i32, i32) {
    %c0_i32 = arith.constant 0 : i32
    %c0_i32_0 = arith.constant 0 : i32
    %c0_i32_1 = arith.constant 0 : i32
    return %c0_i32, %c0_i32_0 : i32, i32
  }
  func.func @transform_17(%arg0: i32) -> (i32, i32) {
    %c0_i32 = arith.constant 0 : i32
    %c0_i32_0 = arith.constant 0 : i32
    %c0_i32_1 = arith.constant 0 : i32
    return %c0_i32, %c0_i32_0 : i32, i32
  }
  func.func @transform_18(%arg0: i32) -> (i32, i32) {
    %c0_i32 = arith.constant 0 : i32
    %c0_i32_0 = arith.constant 0 : i32
    %c0_i32_1 = arith.constant 0 : i32
    return %c0_i32, %c0_i32_0 : i32, i32
  }
  func.func @transform_19(%arg0: i32) -> (i32, i32) {
    %c0_i32 = arith.constant 0 : i32
    %c0_i32_0 = arith.constant 0 : i32
    %c0_i32_1 = arith.constant 0 : i32
    return %c0_i32, %c0_i32_0 : i32, i32
  }
  func.func @transform_20(%arg0: i32) -> (i32, i32, i32) {
    %c0_i32 = arith.constant 0 : i32
    %c0_i32_0 = arith.constant 0 : i32
    %c0_i32_1 = arith.constant 0 : i32
    return %arg0, %c0_i32, %c0_i32_0 : i32, i32, i32
  }
}

</mosaic_0001>

<bundles_post_ra>
// kernel: tree_model_forward.1
= control target key start
LH: loop header
LB: loop body
LE: loop exit
PB: predicated region body
PF: predicated region fallthrough
CT: control target
= control target key end

     0   :  { %s2902_s0 = inlined_call_operand.vmem [shape: f32[2,8,4], index: 0, kind: input, shape index: {}]   ;;  %s2903_s1 = inlined_call_operand.vmem [shape: f32[2,8,2], index: 1, kind: input, shape index: {}]   ;;  %s2904_s2 = inlined_call_operand.vmem [shape: f32[2,8,4], index: 2, kind: input, shape index: {}]   ;;  %s2905_s3 = inlined_call_operand.vmem [shape: f32[4,32], index: 3, kind: input, shape index: {}]   ;;  %s2906_s4 = inlined_call_operand.vmem [shape: f32[2,32], index: 4, kind: input, shape index: {}]   ;;  %s2907_s5 = inlined_call_operand.vmem [shape: f32[1,32], index: 5, kind: input, shape index: {}]   ;;  %s2908_s6 = inlined_call_operand.vmem [shape: f32[32,32], index: 6, kind: input, shape index: {}]   ;;  %s2909_s7 = inlined_call_operand.vmem [shape: f32[1,32], index: 7, kind: input, shape index: {}]   ;;  %s2910_s8 = inlined_call_operand.vmem [shape: f32[32,32], index: 8, kind: input, shape index: {}]   ;;  %s2911_s9 = inlined_call_operand.vmem [shape: f32[1,32], index: 9, kind: input, shape index: {}]   ;;  %s2912_s10 = inlined_call_operand.vmem [shape: f32[32,32], index: 10, kind: input, shape index: {}]   ;;  %s2913_s11 = inlined_call_operand.vmem [shape: f32[1,32], index: 11, kind: input, shape index: {}]   ;;  %s2914_s12 = inlined_call_operand.vmem [shape: f32[32,50], index: 12, kind: input, shape index: {}]   ;;  %s2915_s13 = inlined_call_operand.vmem [shape: f32[32,50], index: 13, kind: input, shape index: {}]   ;;  %s2916_s14 = inlined_call_operand.vmem [shape: f32[1,50], index: 14, kind: input, shape index: {}]   ;;  %s2917_s15 = inlined_call_operand.vmem [shape: f32[50,6], index: 15, kind: input, shape index: {}]   ;;  %s2918_s16 = inlined_call_operand.vmem [shape: f32[1,6], index: 16, kind: input, shape index: {}]   ;;  %s2919_s17 = inlined_call_operand.vmem [shape: f32[32,10], index: 17, kind: input, shape index: {}]   ;;  %s2920_s18 = inlined_call_operand.vmem [shape: f32[32,10], index: 18, kind: input, shape index: {}]   ;;  %s2921_s19 = inlined_call_operand.vmem [shape: f32[1,10], index: 19, kind: input, shape index: {}]   ;;  %s2922_s20 = inlined_call_operand.vmem [shape: f32[2,8,2], index: 20, kind: output, shape index: {}]  }
   0x1   :  { %2923 = sst [smem:[#allocation2_spill]] %s2902_s0 }
   0x2   :  { %2924 = sst [smem:[#allocation3_spill]] %s2903_s1  ;;  %s2344_s1 = smov 0  }
   0x3   :  { %2925 = sst [smem:[#allocation4_spill]] %s2904_s2 }
   0x4   :  { %2926 = sst [smem:[#allocation5_spill]] %s2905_s3 }
   0x5   :  { %2927 = sst [smem:[#allocation6_spill]] %s2906_s4 }
   0x6 LB: > { %s2097_s22 = sadd.s32 4294967295, %s2230_s1   ;;  %p2101_p0 = scmp.ge.s32.totalorder %s2230_s1, 1  ;;  %s2230_s1 = sphi %s2344_s1, %s30_s1  }
   0x7   : > { %p579_p1 = scmp.lt.s32.totalorder %s2230_s1, 3 }
   0x9   : > { %p580_p2 = pnand %p2101_p0, %p579_p1 }
   0xa   : > { %s2928_s2 = sld [smem:[#allocation6_spill]] (!%p580_p2)  ;;  %p643_p3 = scmp.lt.s32.totalorder (!%p580_p2), %s2097_s22, 1 }
   0xb   : > { %583 = sbr.rel (%p580_p2) target bundleno = 4533 (0x11b5), region = 100  ;;  %s2929_s26 = sld [smem:[#allocation5_spill]] (!%p580_p2) }
   0xc   : > { %s2930_s29 = sld [smem:[#allocation3_spill]] (!%p580_p2) }
   0xd   : > { %s2931_s23 = sld [smem:[#allocation2_spill]] (!%p580_p2) }
   0xe   : > { %s2938_s21 = sld [smem:[#allocation4_spill]] (!%p580_p2) }
  0x10   : > { %v663_v0 = vld [vmem:[%s2928_s2] sm:$0x3]  ;;  %vm668_vm0 = vcmask 1041408   ;;  %vm696_vm1 = vcmask 1043456   ;;  %s2940_s22 = smov (!%p643_p3, %s2097_s22), 1  ;;  %vm664_vm2 = vcmask 15360  }
  0x11   : > { %v662_v1 = vld [vmem:[%s2929_s26] sm:$0xf]  ;;  %2106 = vmatpush.msk.msra.mxu0 %vm668_vm0, %v663_v0  ;;  %s2359_s27 = sshll.u32 %s2940_s22, 3  ;;  %vm692_vm3 = vcmask 31744   ;;  %v729_v4 = vld [vmem:[%s2908_s6 + $0x18] sm:$0xff]  ;;  %v728_v5 = vld [vmem:[%s2908_s6 + $0x10] sm:$0xff] }
  0x12   : > { %2108 = vmatpush.msk.msra.mxu1 %vm696_vm1, %v662_v1  ;;  %s650_s30 = scalar_lea.vmem %s2930_s29, %s2359_s27  ;;  %750 = vmatpush.msra.mxu2 %v729_v4  ;;  %v727_v6 = vld [vmem:[%s2908_s6 + $0x8] sm:$0xff]  ;;  %v726_v7 = vld [vmem:[%s2908_s6] sm:$0xff]  ;;  %v762_v8 = vld [vmem:[%s2910_s8 + $0x18] sm:$0xff]  ;;  %vm734_vm4 = vcmask 261120   ;;  %v2232_v44 = vmov 8.0   ;;  %vm918_vm6 = vcmask 408576   ;;  %s658_s3 = scalar_lea.vmem %s2922_s20, %s2359_s27 }
  0x13   : > { %v660_v2 = vld [vmem:[%s650_s30] sm:$0xff]  ;;  %s646_s24 = scalar_lea.vmem %s2931_s23, %s2359_s27  ;;  %782 = vmatpush.msra.mxu3 %v762_v8  ;;  %v761_v15 = vld [vmem:[%s2910_s8 + $0x10] sm:$0xff]  ;;  %v760_v16 = vld [vmem:[%s2910_s8 + $0x8] sm:$0xff]  ;;  %2174 = vrcp.f32 %v2232_v44  ;;  %vm945_vm7 = vcmask 24576   ;;  %s2233_s26 = smov 127  }
  0x14   : > { %2107 = vmatmul.msk.f32.vlgmr.msra.gmra.mxu0 %vm664_vm2, %v660_v2  ;;  %v2370_v3 = vld [vmem:[%s646_s24] sm:$0xff]  ;;  %751 = vmatpush.msra.mxu2 %v728_v5  ;;  %v794_v18 = vld [vmem:[%s2912_s10 + $0x18] sm:$0xff]  ;;  %v793_v19 = vld [vmem:[%s2912_s10 + $0x10] sm:$0xff]  ;;  %s2236_s29 = smov 124   ;;  %s654_s23 = scalar_lea.vmem %s2938_s21, %s2359_s27 }
  0x15   : > { %2109 = vmatmul.msk.f32.vlgmr.msra.gmra.mxu1 %vm692_vm3, %v2370_v3  ;;  %v2170_v10 = vld [vmem:[%s2907_s5] ss:$0 sm:$0xff]  ;;  %783 = vmatpush.msra.mxu3 %v761_v15  ;;  %v792_v24 = vld [vmem:[%s2912_s10 + $0x8] sm:$0xff]  ;;  %v2425_v30 = vld [vmem:[%s2914_s12 + $0x18] sm:$0xff]  ;;  %s2237_s24 = smov 8   ;;  %s2238_s22 = smov 120  }
  0x16   : > { %752 = vmatpush.msra.mxu2 %v727_v6  ;;  %v759_v17 = vld [vmem:[%s2910_s8] sm:$0xff]  ;;  %814 = vmatpush.msrb.mxu0 %v794_v18  ;;  %v860_v31 = vld [vmem:[%s2915_s13 + $0x18] sm:$0xff]  ;;  %v2437_v33 = vld [vmem:[%s2914_s12 + $0x10] sm:$0xff] }
  0x17   : > { %784 = vmatpush.msra.mxu3 %v760_v16  ;;  %v2171_v20 = vld [vmem:[%s2909_s7] ss:$0 sm:$0xff]  ;;  %v1032_v32 = vld [vmem:[%s2920_s18 + $0x18] sm:$0xff]  ;;  %876 = vmatpush.msrb.mxu1 %v860_v31  ;;  %v859_v34 = vld [vmem:[%s2915_s13 + $0x10] sm:$0xff] }
  0x18   : > { %753 = vmatpush.msra.mxu2 %v726_v7  ;;  %815 = vmatpush.msrb.mxu0 %v793_v19  ;;  %v791_v25 = vld [vmem:[%s2912_s10] sm:$0xff]  ;;  %v1031_v35 = vld [vmem:[%s2920_s18 + $0x10] sm:$0xff]  ;;  %v854_v36 = vld [vmem:[%s2914_s12 + $0x8] sm:$0xff] }
  0x19   : > { %785 = vmatpush.msra.mxu3 %v759_v17  ;;  %v2172_v26 = vld [vmem:[%s2911_s9] ss:$0 sm:$0xff]  ;;  %v858_v37 = vld [vmem:[%s2915_s13 + $0x8] sm:$0xff]  ;;  %877 = vmatpush.msrb.mxu1 %v859_v34  ;;  %v2469_v42 = vld [vmem:[%s2919_s17 + $0x18] sm:$0xff]  ;;  %v2175_v47 = vpop.eup %2174 }
  0x1a   : > { %816 = vmatpush.msrb.mxu0 %v792_v24  ;;  %899 = vmatpush.msrb.mxu2 %v2425_v30  ;;  %v1030_v38 = vld [vmem:[%s2920_s18 + $0x8] sm:$0xff]  ;;  %v853_v39 = vld [vmem:[%s2914_s12] sm:$0xff]  ;;  %v2474_v43 = vld [vmem:[%s2919_s17 + $0x10] sm:$0xff]  ;;  %v830_v49 = vmul.f32 8.0, %v2175_v47  ;;  %vm834_vm5 = vweird.f32 %v2175_v47 }
  0x1b   : > { %v857_v40 = vld [vmem:[%s2915_s13] sm:$0xff]  ;;  %878 = vmatpush.msrb.mxu1 %v858_v37  ;;  %v2480_v45 = vld [vmem:[%s2919_s17 + $0x8] sm:$0xff]  ;;  %v916_v0 = vld [vmem:[%s2917_s15 + $0x30] sm:$0x3] }
  0x1c   : > { %817 = vmatpush.msrb.mxu0 %v791_v25  ;;  %900 = vmatpush.msrb.mxu2 %v2437_v33  ;;  %v1029_v41 = vld [vmem:[%s2920_s18] sm:$0xff]  ;;  %v831_v52 = vsub.f32 1.0, %v830_v49  ;;  %v915_v1 = vld [vmem:[%s2917_s15 + $0x28] sm:$0xff]  ;;  %v913_v4 = vld [vmem:[%s2917_s15 + $0x18] sm:$0xff] }
  0x1d   : > { %879 = vmatpush.msrb.mxu1 %v857_v40  ;;  %v2486_v46 = vld [vmem:[%s2919_s17] sm:$0xff]  ;;  %2115 = vmatpush.msk.msrb.mxu3 %vm668_vm0, %v916_v0  ;;  %v912_v5 = vld [vmem:[%s2917_s15 + $0x10] sm:$0xff]  ;;  %v911_v6 = vld [vmem:[%s2917_s15 + $0x8] sm:$0xff]  ;;  %v2234_v40 = vmov 4  }
  0x1e   : > { %1045 = vmatpush.msra.mxu0 %v1032_v32  ;;  %901 = vmatpush.msrb.mxu2 %v854_v36  ;;  %v2173_v48 = vld [vmem:[%s2913_s11] ss:$0 sm:$0xff]  ;;  %v832_v55 = vmul.f32 %v2175_v47, %v831_v52 }
  0x1f   : > { %1065 = vmatpush.msra.mxu1 %v2469_v42  ;;  %v914_v2 = vld [vmem:[%s2917_s15 + $0x20] sm:$0xff]  ;;  %935 = vmatpush.msrb.mxu3 %v915_v1 }
  0x20   : > { %1046 = vmatpush.msra.mxu0 %v1031_v35  ;;  %902 = vmatpush.msrb.mxu2 %v853_v39  ;;  %v833_v58 = vadd.f32 %v2175_v47, %v832_v55  ;;  %v910_v7 = vld [vmem:[%s2917_s15] sm:$0xff] }
  0x21   : > { %1066 = vmatpush.msra.mxu1 %v2474_v43  ;;  %936 = vmatpush.msrb.mxu3 %v914_v2 }
  0x22   : > { %1047 = vmatpush.msra.mxu0 %v1030_v38  ;;  %v835_v61 = vsel %vm834_vm5, %v2175_v47, %v833_v58  ;;  %2164 = vset.pattern.permute.xlu1 %v2234_v40 }
  0x23   : > { %1067 = vmatpush.msra.mxu1 %v2480_v45  ;;  %937 = vmatpush.msrb.mxu3 %v913_v4 }
  0x24   : > { %1048 = vmatpush.msra.mxu0 %v1029_v41  ;;  %2162 = vset.pattern.permute.xlu2 %v2234_v40 }
  0x25   : > { %1068 = vmatpush.msra.mxu1 %v2486_v46  ;;  %938 = vmatpush.msrb.mxu3 %v912_v5 }
  0x26   : > { %2163 = vset.pattern.permute.xlu0 %v2234_v40 }
  0x27   : > { %939 = vmatpush.msrb.mxu3 %v911_v6 }
  0x29   : > { %940 = vmatpush.msrb.mxu3 %v910_v7 }
  0x91   : > { %v689_v9 = vpop.f32.mrf.mxu0 }
  0x92   : > { %v717_v11 = vpop.f32.mrf.mxu1 }
  0x93   : > { %v718_v12 = vadd.f32 %v717_v11, %v689_v9 }
  0x95   : > { %v724_v13 = vadd.f32 %v2170_v10, %v718_v12  ;;  %v2547_v10 = vld [vmem:[%s2916_s14] sm:$0x1] }
  0x97   : > { %v725_v14 = vmax.f32 %v724_v13, 0.0 }
  0x99   : > { %2110 = vmatmul.msk.f32.vlgmr.msra.gmra.mxu2 %vm734_vm4, %v725_v14  ;;  %v2556_v14 = vld [vmem:[%s2918_s16] sm:$0x1] }
  0x9a   : > { %1124 = vmatpush.msra.mxu2 %v2425_v30 }
  0x9c   : > { %1125 = vmatpush.msra.mxu2 %v2437_v33 }
  0x9e   : > { %1126 = vmatpush.msra.mxu2 %v854_v36 }
  0xa0   : > { %1127 = vmatpush.msra.mxu2 %v853_v39 }
 0x11c   : > { %v755_v21 = vpop.f32.mrf.mxu2 }
 0x11d   : > { %v756_v22 = vadd.f32 %v2171_v20, %v755_v21 }
 0x11f   : > { %v758_v23 = vmax.f32 %v756_v22, 0.0 }
 0x121   : > { %2111 = vmatmul.msk.f32.vlgmr.msra.gmra.mxu3 %vm734_vm4, %v758_v23 }
 0x122   : > { %1307 = vmatpush.msra.mxu3 %v2469_v42 }
 0x124   : > { %1308 = vmatpush.msra.mxu3 %v2474_v43 }
 0x126   : > { %1309 = vmatpush.msra.mxu3 %v2480_v45 }
 0x128   : > { %1310 = vmatpush.msra.mxu3 %v2486_v46 }
 0x1a4   : > { %v787_v27 = vpop.f32.mrf.mxu3 }
 0x1a5   : > { %v788_v28 = vadd.f32 %v2172_v26, %v787_v27 }
 0x1a7   : > { %v790_v29 = vmax.f32 %v788_v28, 0.0 }
 0x1a9   : > { %2112 = vmatmul.msk.f32.vlgmr.msrb.gmra.mxu0 %vm734_vm4, %v790_v29 }
 0x1aa   : > { %2123 = vmatpush.msk.msrb.mxu0 %vm668_vm0, %v916_v0 }
 0x1ac   : > { %1147 = vmatpush.msrb.mxu0 %v915_v1 }
 0x1ae   : > { %1148 = vmatpush.msrb.mxu0 %v914_v2 }
 0x1b0   : > { %1149 = vmatpush.msrb.mxu0 %v913_v4 }
 0x1b2   : > { %1150 = vmatpush.msrb.mxu0 %v912_v5 }
 0x1b4   : > { %1151 = vmatpush.msrb.mxu0 %v911_v6 }
 0x1b6   : > { %1152 = vmatpush.msrb.mxu0 %v910_v7 }
 0x226   : > { %v819_v50 = vpop.f32.mrf.mxu0 }
 0x227   : > { %v2493_v51 = vadd.f32 %v2173_v48, %v819_v50 }
 0x229   : > { %v822_v53 = vsel %vm734_vm4, %v2493_v51, 0.0 }
 0x22a   : > { %v823_v54 = vrot.slane %v822_v53, 4 }
 0x22c   : > { %v824_v56 = vadd.f32 %v823_v54, %v822_v53 }
 0x22e   : > { %v825_v57 = vrot.slane %v824_v56, 2 }
 0x230   : > { %v826_v59 = vadd.f32 %v825_v57, %v824_v56 }
 0x232   : > { %v827_v60 = vrot.slane %v826_v59, 1 }
 0x234   : > { %v828_v62 = vadd.f32 %v827_v60, %v826_v59 }
 0x236   : > { %v836_v63 = vmul.f32 %v835_v61, %v828_v62  ;;  %v2235_v62 = vmov 0.0  }
 0x238   : > { %2113 = vmatmul.msk.f32.vlgmr.msrb.gmra.mxu1 %vm734_vm4, %v836_v63  ;;  %2114 = vmatmul.msk.f32.vlgmr.msrb.gmra.mxu2 %vm734_vm4, %v836_v63 }
 0x239   : > { %2120 = vmatmul.msk.f32.vlgmr.msra.gmra.mxu0 %vm734_vm4, %v836_v63  ;;  %1249 = vmatpush.msrb.mxu1 %v2469_v42 }
 0x23a   : > { %1365 = vmatpush.msrb.mxu2 %v2469_v42  ;;  %1548 = vmatpush.msra.mxu0 %v2469_v42 }
 0x23b   : > { %1250 = vmatpush.msrb.mxu1 %v2474_v43 }
 0x23c   : > { %1366 = vmatpush.msrb.mxu2 %v2474_v43  ;;  %1549 = vmatpush.msra.mxu0 %v2474_v43 }
 0x23d   : > { %1251 = vmatpush.msrb.mxu1 %v2480_v45 }
 0x23e   : > { %1367 = vmatpush.msrb.mxu2 %v2480_v45  ;;  %1550 = vmatpush.msra.mxu0 %v2480_v45 }
 0x23f   : > { %1252 = vmatpush.msrb.mxu1 %v2486_v46 }
 0x240   : > { %2121 = vmatmul.msk.f32.vlgmr.msra.gmra.mxu1 %vm734_vm4, %v836_v63  ;;  %1368 = vmatpush.msrb.mxu2 %v2486_v46 }
 0x241   : > { %1423 = vmatpush.msra.mxu1 %v2425_v30  ;;  %1551 = vmatpush.msra.mxu0 %v2486_v46 }
 0x243   : > { %1424 = vmatpush.msra.mxu1 %v2437_v33 }
 0x245   : > { %1425 = vmatpush.msra.mxu1 %v854_v36 }
 0x247   : > { %1426 = vmatpush.msra.mxu1 %v853_v39 }
 0x2b5   : > { %v2542_v8 = vpop.f32.mrf.mxu1 }
 0x2bb   : > { %v904_v9 = vpop.f32.mrf.mxu2 }
 0x2bc   : > { %v905_v11 = vadd.f32 %v904_v9, %v2542_v8 }
 0x2be   : > { %v908_v12 = vadd.f32 %v2547_v10, %v905_v11 }
 0x2c0   : > { %v909_v13 = vmax.f32 %v908_v12, 0.0 }
 0x2c2   : > { %2116 = vmatmul.msk.f32.vlgmr.msrb.gmra.mxu3 %vm918_vm6, %v909_v13 }
 0x2c3   : > { %2132 = vmatpush.msk.msrb.mxu3 %vm668_vm0, %v916_v0  ;;  %vm1005_vm0 = vcmask 39968  }
 0x2c5   : > { %1446 = vmatpush.msrb.mxu3 %v915_v1 }
 0x2c7   : > { %1447 = vmatpush.msrb.mxu3 %v914_v2 }
 0x2c9   : > { %1448 = vmatpush.msrb.mxu3 %v913_v4 }
 0x2cb   : > { %1449 = vmatpush.msrb.mxu3 %v912_v5 }
 0x2cd   : > { %1450 = vmatpush.msrb.mxu3 %v911_v6 }
 0x2cf   : > { %1451 = vmatpush.msrb.mxu3 %v910_v7 }
 0x345   : > { %v942_v15 = vpop.f32.mrf.mxu3 }
 0x346   : > { %v943_v16 = vadd.f32 %v942_v15, %v2556_v14 }
 0x348   : > { %v946_v17 = vsel %vm945_vm7, %v943_v16, -inf  ;;  %v2568_v38 = vperm.slane %v943_v16, 0 }
 0x349   : > { %947 = vmax.xlane.f32.xlu0 %v946_v17 }
 0x3bc   : > { %v948_v18 = vpop.xlane.xlu0 %947 }
 0x3bd   : > { %v949_v19 = vsub.f32 %v943_v16, %v948_v18 }
 0x3bf   : > { %v950_v20 = vmul.f32 1.442695, %v949_v19 }
 0x3c1   : > { %2176 = vpow2.f32 %v950_v20 }
 0x3c7   : > { %v2177_v21 = vpop.eup %2176 }
 0x3c8   : > { %v952_v22 = vsel %vm945_vm7, %v2177_v21, 0.0 }
 0x3c9   : > { %953 = vadd.xlane.f32.xlu0 %v952_v22 }
 0x43c   : > { %v954_v23 = vpop.xlane.xlu0 %953 }
 0x43d   : > { %2178 = vrcp.f32 %v954_v23  ;;  %v966_v27 = vand.u32 2147483648, %v954_v23  ;;  %v964_v29 = vand.u32 2147483647, %v954_v23  ;;  %vm960_vm9 = vweird.f32 %v954_v23 }
 0x43f   : > { %v967_v31 = vor.u32 1.1754944e-38, %v966_v27  ;;  %vm965_vm11 = vcmp.eq.f32.partialorder %v964_v29, 8.507059e+37 }
 0x443   : > { %v2179_v24 = vpop.eup %2178 }
 0x444   : > { %v956_v25 = vmul.f32 %v2179_v24, %v954_v23  ;;  %vm961_vm8 = vweird.f32 %v2179_v24 }
 0x445   : > { %vm962_vm10 = vmor %vm960_vm9, %vm961_vm8 }
 0x446   : > { %v957_v26 = vsub.f32 1.0, %v956_v25 }
 0x448   : > { %v958_v28 = vmul.f32 %v2179_v24, %v957_v26 }
 0x44a   : > { %v959_v30 = vadd.f32 %v2179_v24, %v958_v28 }
 0x44c   : > { %v963_v32 = vsel %vm962_vm10, %v2179_v24, %v959_v30 }
 0x44d   : > { %v968_v33 = vsel %vm965_vm11, %v967_v31, %v963_v32 }
 0x44e   : > { %v2561_v34 = vmul.f32 %v2177_v21, %v968_v33 }
 0x450   : > { %v970_v35 = vperm.slane %v2561_v34, 0 }
 0x452   : > { %v971_v36 = vmul.f32 %v970_v35, %v2370_v3 }
 0x454   : > { %v972_v37 = vsel %vm692_vm3, %v971_v36, 0.0 }
 0x455   : > { %973 = vadd.xlane.f32.xlu1 %v972_v37 }
 0x46e   : > { %978 = vrot.lane.b32.xlu1 %v2568_v38, %s2233_s26 }
 0x4c8   : > { %v974_v39 = vpop.xlane.xlu1 %973 }
 0x4c9   : > { %v976_v41 = vadd.f32 %v2568_v38, %v974_v39 }
 0x4e0   : > { %v2573_v44 = vpop.permute.xlu1 %978 }
 0x4e1   : > { %v981_v47 = vmul.f32 %v2573_v44, %v976_v41 }
 0x4e3   : > { %v2117_v48 = vmul.f32 -1.442695, %v981_v47 }
 0x4e5   : > { %2180 = vpow2.f32 %v2117_v48 }
 0x4eb   : > { %v2181_v49 = vpop.eup %2180 }
 0x4ec   : > { %v985_v50 = vadd.f32 1.0, %v2181_v49 }
 0x4ee   : > { %2182 = vrcp.f32 %v985_v50  ;;  %v997_v55 = vand.u32 2147483648, %v985_v50  ;;  %v995_v57 = vand.u32 2147483647, %v985_v50  ;;  %vm991_vm13 = vweird.f32 %v985_v50 }
 0x4f0   : > { %v998_v59 = vor.u32 1.1754944e-38, %v997_v55  ;;  %vm996_vm15 = vcmp.eq.f32.partialorder %v995_v57, 8.507059e+37 }
 0x4f4   : > { %v2183_v52 = vpop.eup %2182 }
 0x4f5   : > { %v987_v53 = vmul.f32 %v2183_v52, %v985_v50  ;;  %vm992_vm12 = vweird.f32 %v2183_v52 }
 0x4f6   : > { %vm993_vm14 = vmor %vm991_vm13, %vm992_vm12 }
 0x4f7   : > { %v988_v54 = vsub.f32 1.0, %v987_v53 }
 0x4f9   : > { %v989_v56 = vmul.f32 %v2183_v52, %v988_v54 }
 0x4fb   : > { %v990_v58 = vadd.f32 %v2183_v52, %v989_v56 }
 0x4fd   : > { %v994_v60 = vsel %vm993_vm14, %v2183_v52, %v990_v58 }
 0x4fe   : > { %v999_v61 = vsel %vm996_vm15, %v998_v59, %v994_v60 }
 0x4ff   : > { %vm1001_vm1 = vcmp.gt.f32.partialorder %v999_v61, 0.5 }
 0x500   : > { %v2577_v63 = vsel %vm1001_vm1, 1.0, %v2235_v62 }
 0x501   : > { %v2580_v0 = vsub.f32 1.0, %v2577_v63  ;;  %v1006_v1 = vsel %vm1005_vm0, %v2577_v63, 0.0 }
 0x502   : > { %v1007_v2 = vrot.slane %v1006_v1, 4 }
 0x503   : > { %1377 = vperm.xlu1 %2164, %v2580_v0   ;;  %v1014_v4 = vsel %vm1005_vm0, %v2580_v0, 0.0 }
 0x504   : > { %v1008_v5 = vadd.f32 %v1007_v2, %v1006_v1  ;;  %v1015_v6 = vrot.slane %v1014_v4, 4 }
 0x506   : > { %v1009_v7 = vrot.slane %v1008_v5, 2  ;;  %v1016_v9 = vadd.f32 %v1015_v6, %v1014_v4 }
 0x508   : > { %v1010_v11 = vadd.f32 %v1009_v7, %v1008_v5  ;;  %v1017_v12 = vrot.slane %v1016_v9, 2 }
 0x50a   : > { %v1011_v13 = vrot.slane %v1010_v11, 1  ;;  %v1018_v15 = vadd.f32 %v1017_v12, %v1016_v9 }
 0x50c   : > { %v1012_v16 = vadd.f32 %v1011_v13, %v1010_v11  ;;  %v1019_v17 = vrot.slane %v1018_v15, 1 }
 0x50e   : > { %v1075_v18 = vadd.f32 1e-08, %v1012_v16  ;;  %v1020_v19 = vadd.f32 %v1019_v17, %v1018_v15  ;;  %vm1013_vm5 = vcmp.eq.f32.partialorder %v1012_v16, 0.0 }
 0x510   : > { %1091 = vperm.xlu2 %2162, %v1075_v18   ;;  %vm1021_vm8 = vcmp.eq.f32.partialorder %v1020_v19, 0.0 }
 0x511   : > { %vm2587_vm9 = vmor %vm1013_vm5, %vm1021_vm8 }
 0x518   : > { %1078 = vperm.xlu2 %2162, %v2577_v63  }
 0x56a   : > { %v1092_v21 = vpop.permute.xlu2 %1091 }
 0x56b   : > { %2184 = vrcp.f32 %v1092_v21  ;;  %v1105_v33 = vand.u32 2147483648, %v1092_v21  ;;  %vm1099_vm11 = vweird.f32 %v1092_v21  ;;  %v1103_v36 = vand.u32 2147483647, %v1092_v21 }
 0x56d   : > { %v1106_v41 = vor.u32 1.1754944e-38, %v1105_v33  ;;  %vm1104_vm13 = vcmp.eq.f32.partialorder %v1103_v36, 8.507059e+37 }
 0x571   : > { %v2185_v22 = vpop.eup %2184 }
 0x572   : > { %v1095_v23 = vmul.f32 %v2185_v22, %v1092_v21  ;;  %v1079_v24 = vpop.permute.xlu2 %1078  ;;  %vm1100_vm10 = vweird.f32 %v2185_v22 }
 0x573   : > { %v1081_v25 = vmul.f32 %v1079_v24, %v2493_v51  ;;  %vm1101_vm12 = vmor %vm1099_vm11, %vm1100_vm10 }
 0x574   : > { %v1096_v26 = vsub.f32 1.0, %v1095_v23 }
 0x575   : > { %v1082_v27 = vsel %vm734_vm4, %v1081_v25, 0.0  ;;  %v1378_v59 = vpop.permute.xlu1 %1377 }
 0x576   : > { %v1097_v28 = vmul.f32 %v2185_v22, %v1096_v26  ;;  %v1083_v29 = vrot.slane %v1082_v27, 4  ;;  %v1380_v60 = vmul.f32 %v1378_v59, %v2493_v51 }
 0x578   : > { %v1084_v30 = vadd.f32 %v1083_v29, %v1082_v27  ;;  %v1098_v31 = vadd.f32 %v2185_v22, %v1097_v28  ;;  %v1381_v1 = vsel %vm734_vm4, %v1380_v60, 0.0 }
 0x579   : > { %v1382_v4 = vrot.slane %v1381_v1, 4 }
 0x57a   : > { %v1085_v32 = vrot.slane %v1084_v30, 2  ;;  %v1102_v39 = vsel %vm1101_vm12, %v2185_v22, %v1098_v31 }
 0x57b   : > { %v1107_v48 = vsel %vm1104_vm13, %v1106_v41, %v1102_v39  ;;  %v1383_v5 = vadd.f32 %v1382_v4, %v1381_v1 }
 0x57c   : > { %v1086_v37 = vadd.f32 %v1085_v32, %v1084_v30 }
 0x57d   : > { %v1384_v7 = vrot.slane %v1383_v5, 2 }
 0x57e   : > { %v1087_v40 = vrot.slane %v1086_v37, 1 }
 0x57f   : > { %v1385_v11 = vadd.f32 %v1384_v7, %v1383_v5 }
 0x580   : > { %v1088_v47 = vadd.f32 %v1087_v40, %v1086_v37 }
 0x581   : > { %v1386_v16 = vrot.slane %v1385_v11, 1 }
 0x582   : > { %v1108_v49 = vmul.f32 %v1107_v48, %v1088_v47 }
 0x583   : > { %v1387_v22 = vadd.f32 %v1386_v16, %v1385_v11 }
 0x584   : > { %2122 = vmatmul.msk.f32.vlgmr.msra.gmra.mxu2 %vm734_vm4, %v1108_v49  ;;  %2128 = vmatmul.msk.f32.vlgmr.msrb.gmra.mxu1 %vm734_vm4, %v1108_v49 }
 0x585   : > { %1606 = vmatpush.msra.mxu2 %v2469_v42  ;;  %1664 = vmatpush.msrb.mxu1 %v2469_v42  ;;  %v2607_v42 = vpop.f32.mrf.mxu0 }
 0x587   : > { %1607 = vmatpush.msra.mxu2 %v2474_v43  ;;  %1665 = vmatpush.msrb.mxu1 %v2474_v43 }
 0x589   : > { %1608 = vmatpush.msra.mxu2 %v2480_v45  ;;  %1666 = vmatpush.msrb.mxu1 %v2480_v45  ;;  %v1374_v45 = vadd.f32 1e-08, %v1020_v19 }
 0x58b   : > { %1609 = vmatpush.msra.mxu2 %v2486_v46  ;;  %1667 = vmatpush.msrb.mxu1 %v2486_v46 }
 0x607   : > { %v1129_v50 = vpop.f32.mrf.mxu2 }
 0x608   : > { %v1130_v52 = vadd.f32 %v1129_v50, %v2542_v8 }
 0x60a   : > { %v1132_v53 = vadd.f32 %v1130_v52, %v2547_v10 }
 0x60c   : > { %v1133_v54 = vmax.f32 %v1132_v53, 0.0 }
 0x60e   : > { %2124 = vmatmul.msk.f32.vlgmr.msrb.gmra.mxu0 %vm918_vm6, %v1133_v54 }
 0x68b   : > { %v1154_v55 = vpop.f32.mrf.mxu0 }
 0x68c   : > { %v1155_v43 = vadd.f32 %v1154_v55, %v2556_v14 }
 0x68e   : > { %v1157_v56 = vsel %vm945_vm7, %v1155_v43, -inf  ;;  %v2614_v24 = vperm.slane %v1155_v43, 0 }
 0x68f   : > { %1158 = vmax.xlane.f32.xlu0 %v1157_v56 }
 0x6a3   : > { %1390 = vperm.xlu0 %2163, %v1374_v45  }
 0x702   : > { %v1159_v57 = vpop.xlane.xlu0 %1158 }
 0x703   : > { %v1160_v46 = vsub.f32 %v1155_v43, %v1159_v57 }
 0x705   : > { %v1161_v58 = vmul.f32 1.442695, %v1160_v46 }
 0x707   : > { %2186 = vpow2.f32 %v1161_v58 }
 0x70d   : > { %v2187_v61 = vpop.eup %2186 }
 0x70e   : > { %v1163_v2 = vsel %vm945_vm7, %v2187_v61, 0.0 }
 0x70f   : > { %1164 = vadd.xlane.f32.xlu2 %v1163_v2 }
 0x715   : > { %v1391_v6 = vpop.permute.xlu0 %1390 }
 0x716   : > { %2188 = vrcp.f32 %v1391_v6  ;;  %v1404_v15 = vand.u32 2147483648, %v1391_v6  ;;  %v1402_v18 = vand.u32 2147483647, %v1391_v6  ;;  %vm1398_vm15 = vweird.f32 %v1391_v6 }
 0x718   : > { %v1405_v21 = vor.u32 1.1754944e-38, %v1404_v15  ;;  %vm1403_vm5 = vcmp.eq.f32.partialorder %v1402_v18, 8.507059e+37 }
 0x71c   : > { %v2189_v9 = vpop.eup %2188 }
 0x71d   : > { %v1394_v12 = vmul.f32 %v2189_v9, %v1391_v6  ;;  %vm1399_vm14 = vweird.f32 %v2189_v9 }
 0x71e   : > { %vm1400_vm1 = vmor %vm1398_vm15, %vm1399_vm14 }
 0x71f   : > { %v1395_v13 = vsub.f32 1.0, %v1394_v12 }
 0x721   : > { %v1396_v17 = vmul.f32 %v2189_v9, %v1395_v13 }
 0x723   : > { %v1397_v19 = vadd.f32 %v2189_v9, %v1396_v17 }
 0x725   : > { %v1401_v23 = vsel %vm1400_vm1, %v2189_v9, %v1397_v19 }
 0x726   : > { %v1406_v25 = vsel %vm1403_vm5, %v1405_v21, %v1401_v23 }
 0x727   : > { %1189 = vrot.lane.b32.xlu2 %v2614_v24, %s2233_s26  ;;  %v1407_v26 = vmul.f32 %v1406_v25, %v1387_v22 }
 0x729   : > { %2131 = vmatmul.msk.f32.vlgmr.msra.gmra.mxu1 %vm734_vm4, %v1407_v26  ;;  %2137 = vmatmul.msk.f32.vlgmr.msra.gmra.mxu0 %vm734_vm4, %v1407_v26 }
 0x782   : > { %v1165_v27 = vpop.xlane.xlu2 %1164 }
 0x783   : > { %2190 = vrcp.f32 %v1165_v27  ;;  %v1177_v31 = vand.u32 2147483648, %v1165_v27  ;;  %v1175_v33 = vand.u32 2147483647, %v1165_v27  ;;  %vm1171_vm10 = vweird.f32 %v1165_v27 }
 0x785   : > { %v1178_v37 = vor.u32 1.1754944e-38, %v1177_v31  ;;  %vm1176_vm12 = vcmp.eq.f32.partialorder %v1175_v33, 8.507059e+37 }
 0x789   : > { %v2191_v28 = vpop.eup %2190 }
 0x78a   : > { %v1167_v29 = vmul.f32 %v2191_v28, %v1165_v27  ;;  %vm1172_vm8 = vweird.f32 %v2191_v28  ;;  %v2628_v53 = vpop.permute.xlu2 %1189 }
 0x78b   : > { %vm1173_vm11 = vmor %vm1171_vm10, %vm1172_vm8 }
 0x78c   : > { %v1168_v30 = vsub.f32 1.0, %v1167_v29 }
 0x78e   : > { %v1169_v32 = vmul.f32 %v2191_v28, %v1168_v30 }
 0x790   : > { %v1170_v36 = vadd.f32 %v2191_v28, %v1169_v32 }
 0x792   : > { %v1174_v39 = vsel %vm1173_vm11, %v2191_v28, %v1170_v36 }
 0x793   : > { %v1179_v40 = vsel %vm1176_vm12, %v1178_v37, %v1174_v39 }
 0x794   : > { %v2620_v41 = vmul.f32 %v2187_v61, %v1179_v40  ;;  %v2642_v40 = vpop.f32.mrf.mxu1 }
 0x796   : > { %v1181_v47 = vperm.slane %v2620_v41, 0 }
 0x798   : > { %v1182_v48 = vmul.f32 %v1181_v47, %v2370_v3 }
 0x79a   : > { %v1183_v49 = vsel %vm692_vm3, %v1182_v48, 0.0 }
 0x79b   : > { %1184 = vadd.xlane.f32.xlu1 %v1183_v49 }
 0x80e   : > { %v1185_v50 = vpop.xlane.xlu1 %1184 }
 0x80f   : > { %v1187_v52 = vadd.f32 %v2614_v24, %v1185_v50 }
 0x811   : > { %v1192_v54 = vmul.f32 %v2628_v53, %v1187_v52 }
 0x813   : > { %v2125_v55 = vmul.f32 -1.442695, %v1192_v54 }
 0x815   : > { %2192 = vpow2.f32 %v2125_v55 }
 0x81b   : > { %v2193_v43 = vpop.eup %2192 }
 0x81c   : > { %v1196_v56 = vadd.f32 1.0, %v2193_v43 }
 0x81e   : > { %2194 = vrcp.f32 %v1196_v56  ;;  %v1208_v58 = vand.u32 2147483648, %v1196_v56  ;;  %v1206_v60 = vand.u32 2147483647, %v1196_v56  ;;  %vm1202_vm14 = vweird.f32 %v1196_v56 }
 0x820   : > { %v1209_v1 = vor.u32 1.1754944e-38, %v1208_v58  ;;  %vm1207_vm1 = vcmp.eq.f32.partialorder %v1206_v60, 8.507059e+37  ;;  %v2646_v60 = vpop.f32.mrf.mxu1 }
 0x824   : > { %v2195_v45 = vpop.eup %2194 }
 0x825   : > { %v1198_v57 = vmul.f32 %v2195_v45, %v1196_v56  ;;  %vm1203_vm13 = vweird.f32 %v2195_v45 }
 0x826   : > { %vm1204_vm15 = vmor %vm1202_vm14, %vm1203_vm13 }
 0x827   : > { %v1199_v46 = vsub.f32 1.0, %v1198_v57 }
 0x829   : > { %v1200_v59 = vmul.f32 %v2195_v45, %v1199_v46 }
 0x82b   : > { %v1201_v61 = vadd.f32 %v2195_v45, %v1200_v59 }
 0x82d   : > { %v1205_v2 = vsel %vm1204_vm15, %v2195_v45, %v1201_v61 }
 0x82e   : > { %v1210_v4 = vsel %vm1207_vm1, %v1209_v1, %v1205_v2 }
 0x82f   : > { %vm1212_vm5 = vcmp.gt.f32.partialorder %v1210_v4, 0.5 }
 0x830   : > { %v2126_v5 = vsel %vm1212_vm5, 1.0, %v2235_v62 }
 0x831   : > { %v1216_v6 = vsub.f32 1.0, %v2126_v5  ;;  %v1215_v7 = vmul.f32 %v2126_v5, %v2577_v63 }
 0x833   : > { %v1217_v9 = vmul.f32 %v2577_v63, %v1216_v6  ;;  %v1218_v11 = vsel %vm1005_vm0, %v1215_v7, 0.0 }
 0x834   : > { %v1219_v12 = vrot.slane %v1218_v11, 4 }
 0x835   : > { %1319 = vperm.xlu1 %2164, %v1217_v9   ;;  %v1226_v13 = vsel %vm1005_vm0, %v1217_v9, 0.0 }
 0x836   : > { %v1227_v15 = vrot.slane %v1226_v13, 4  ;;  %v1220_v16 = vadd.f32 %v1219_v12, %v1218_v11 }
 0x838   : > { %v1228_v17 = vadd.f32 %v1227_v15, %v1226_v13  ;;  %v1221_v18 = vrot.slane %v1220_v16, 2 }
 0x83a   : > { %v1229_v19 = vrot.slane %v1228_v17, 2  ;;  %v1222_v21 = vadd.f32 %v1221_v18, %v1220_v16 }
 0x83c   : > { %v1223_v22 = vrot.slane %v1222_v21, 1  ;;  %v1230_v23 = vadd.f32 %v1229_v19, %v1228_v17 }
 0x83e   : > { %v1224_v25 = vadd.f32 %v1223_v22, %v1222_v21  ;;  %v1231_v26 = vrot.slane %v1230_v23, 1 }
 0x840   : > { %v1258_v27 = vadd.f32 1e-08, %v1224_v25  ;;  %v1232_v28 = vadd.f32 %v1231_v26, %v1230_v23  ;;  %vm1225_vm8 = vcmp.eq.f32.partialorder %v1224_v25, 0.0  ;;  %v1428_v23 = vpop.f32.mrf.mxu1 }
 0x842   : > { %1274 = vperm.xlu0 %2163, %v1258_v27   ;;  %v1316_v63 = vadd.f32 1e-08, %v1232_v28  ;;  %vm1233_vm10 = vcmp.eq.f32.partialorder %v1232_v28, 0.0  ;;  %v1429_v28 = vadd.f32 %v1428_v23, %v2542_v8 }
 0x843   : > { %vm2636_vm11 = vmor %vm1225_vm8, %vm1233_vm10 }
 0x844   : > { %1332 = vperm.xlu1 %2164, %v1316_v63  }
 0x84a   : > { %1261 = vperm.xlu0 %2163, %v1215_v7  }
 0x8a7   : > { %v1320_v30 = vpop.permute.xlu1 %1319 }
 0x8a8   : > { %v1322_v31 = vmul.f32 %v1320_v30, %v2493_v51  ;;  %v1431_v30 = vadd.f32 %v1429_v28, %v2547_v10 }
 0x8aa   : > { %v1323_v32 = vsel %vm734_vm4, %v1322_v31, 0.0  ;;  %v1432_v31 = vmax.f32 %v1431_v30, 0.0 }
 0x8ab   : > { %v1324_v33 = vrot.slane %v1323_v32, 4 }
 0x8ad   : > { %v1325_v37 = vadd.f32 %v1324_v33, %v1323_v32 }
 0x8af   : > { %v1326_v48 = vrot.slane %v1325_v37, 2 }
 0x8b1   : > { %v1327_v55 = vadd.f32 %v1326_v48, %v1325_v37 }
 0x8b3   : > { %v1328_v61 = vrot.slane %v1327_v55, 1 }
 0x8b4   : > { %v1275_v36 = vpop.permute.xlu0 %1274 }
 0x8b5   : > { %2196 = vrcp.f32 %v1275_v36  ;;  %v1329_v11 = vadd.f32 %v1328_v61, %v1327_v55  ;;  %vm1282_vm15 = vweird.f32 %v1275_v36  ;;  %v1288_v12 = vand.u32 2147483648, %v1275_v36 }
 0x8b6   : > { %v1333_v39 = vpop.permute.xlu1 %1332  ;;  %v1286_v15 = vand.u32 2147483647, %v1275_v36 }
 0x8b7   : > { %2198 = vrcp.f32 %v1333_v39  ;;  %v1346_v1 = vand.u32 2147483648, %v1333_v39  ;;  %v1344_v4 = vand.u32 2147483647, %v1333_v39  ;;  %vm1340_vm13 = vweird.f32 %v1333_v39 }
 0x8b8   : > { %v1289_v25 = vor.u32 1.1754944e-38, %v1288_v12  ;;  %vm1287_vm10 = vcmp.eq.f32.partialorder %v1286_v15, 8.507059e+37 }
 0x8b9   : > { %v1347_v13 = vor.u32 1.1754944e-38, %v1346_v1  ;;  %vm1345_vm5 = vcmp.eq.f32.partialorder %v1344_v4, 8.507059e+37 }
 0x8bb   : > { %v2197_v49 = vpop.eup %2196 }
 0x8bc   : > { %v1278_v50 = vmul.f32 %v2197_v49, %v1275_v36  ;;  %v1262_v52 = vpop.permute.xlu0 %1261  ;;  %vm1283_vm14 = vweird.f32 %v2197_v49 }
 0x8bd   : > { %v2199_v54 = vpop.eup %2198  ;;  %v1264_v43 = vmul.f32 %v1262_v52, %v2493_v51  ;;  %vm1284_vm8 = vmor %vm1282_vm15, %vm1283_vm14 }
 0x8be   : > { %v1279_v56 = vsub.f32 1.0, %v1278_v50  ;;  %v1336_v45 = vmul.f32 %v2199_v54, %v1333_v39  ;;  %vm1341_vm12 = vweird.f32 %v2199_v54 }
 0x8bf   : > { %v1265_v57 = vsel %vm734_vm4, %v1264_v43, 0.0  ;;  %vm1342_vm1 = vmor %vm1340_vm13, %vm1341_vm12 }
 0x8c0   : > { %v1280_v46 = vmul.f32 %v2197_v49, %v1279_v56  ;;  %v1337_v58 = vsub.f32 1.0, %v1336_v45  ;;  %v1266_v59 = vrot.slane %v1265_v57, 4 }
 0x8c2   : > { %v1338_v2 = vmul.f32 %v2199_v54, %v1337_v58  ;;  %v1267_v5 = vadd.f32 %v1266_v59, %v1265_v57  ;;  %v1281_v6 = vadd.f32 %v2197_v49, %v1280_v46 }
 0x8c4   : > { %v1339_v7 = vadd.f32 %v2199_v54, %v1338_v2  ;;  %v1268_v9 = vrot.slane %v1267_v5, 2  ;;  %v1285_v19 = vsel %vm1284_vm8, %v2197_v49, %v1281_v6  ;;  %v2674_v6 = vld [vmem:[%s2921_s19] sm:$0x1] }
 0x8c5   : > { %v1290_v27 = vsel %vm1287_vm10, %v1289_v25, %v1285_v19 }
 0x8c6   : > { %v1343_v16 = vsel %vm1342_vm1, %v2199_v54, %v1339_v7  ;;  %v1269_v17 = vadd.f32 %v1268_v9, %v1267_v5  ;;  %v1071_v5 = vadd.f32 %v2642_v40, %v2607_v42 }
 0x8c7   : > { %v1348_v18 = vsel %vm1345_vm5, %v1347_v13, %v1343_v16 }
 0x8c8   : > { %v1270_v21 = vrot.slane %v1269_v17, 1  ;;  %v1349_v22 = vmul.f32 %v1348_v18, %v1329_v11  ;;  %v1074_v7 = vadd.f32 %v2674_v6, %v1071_v5 }
 0x8ca   : > { %v1271_v26 = vadd.f32 %v1270_v21, %v1269_v17  ;;  %2130 = vmatmul.msk.f32.vlgmr.msrb.gmra.mxu2 %vm734_vm4, %v1349_v22  ;;  %v2677_v9 = vperm.slane %v1074_v7, 0 }
 0x8cc   : > { %v1291_v63 = vmul.f32 %v1290_v27, %v1271_v26 }
 0x8ce   : > { %2129 = vmatmul.msk.f32.vlgmr.msra.gmra.mxu3 %vm734_vm4, %v1291_v63 }
 0x8d6   : > { %2133 = vmatmul.msk.f32.vlgmr.msrb.gmra.mxu3 %vm918_vm6, %v1432_v31 }
 0x951   : > { %v2653_v32 = vpop.f32.mrf.mxu3 }
 0x959   : > { %v1453_v33 = vpop.f32.mrf.mxu3 }
 0x95a   : > { %v1454_v36 = vadd.f32 %v1453_v33, %v2556_v14 }
 0x95c   : > { %v1456_v37 = vsel %vm945_vm7, %v1454_v36, -inf  ;;  %v2657_v39 = vperm.slane %v1454_v36, 0 }
 0x95d   : > { %1457 = vmax.xlane.f32.xlu0 %v1456_v37 }
 0x971   : > { %1488 = vrot.lane.b32.xlu0 %v2657_v39, %s2233_s26 }
 0x9d0   : > { %v1458_v8 = vpop.xlane.xlu0 %1457 }
 0x9d1   : > { %v1459_v48 = vsub.f32 %v1454_v36, %v1458_v8 }
 0x9d3   : > { %v1460_v49 = vmul.f32 1.442695, %v1459_v48 }
 0x9d5   : > { %2200 = vpow2.f32 %v1460_v49 }
 0x9db   : > { %v2201_v10 = vpop.eup %2200 }
 0x9dc   : > { %v1462_v50 = vsel %vm945_vm7, %v2201_v10, 0.0 }
 0x9dd   : > { %1463 = vadd.xlane.f32.xlu2 %v1462_v50 }
 0x9e3   : > { %v2682_v12 = vpop.permute.xlu0 %1488 }
 0xa50   : > { %v1464_v52 = vpop.xlane.xlu2 %1463 }
 0xa51   : > { %2202 = vrcp.f32 %v1464_v52  ;;  %v1476_v43 = vand.u32 2147483648, %v1464_v52  ;;  %v1474_v45 = vand.u32 2147483647, %v1464_v52  ;;  %vm1470_vm12 = vweird.f32 %v1464_v52 }
 0xa53   : > { %v1477_v46 = vor.u32 1.1754944e-38, %v1476_v43  ;;  %vm1475_vm14 = vcmp.eq.f32.partialorder %v1474_v45, 8.507059e+37 }
 0xa57   : > { %v2203_v54 = vpop.eup %2202 }
 0xa58   : > { %v1466_v14 = vmul.f32 %v2203_v54, %v1464_v52  ;;  %vm1471_vm6 = vweird.f32 %v2203_v54 }
 0xa59   : > { %vm1472_vm13 = vmor %vm1470_vm12, %vm1471_vm6 }
 0xa5a   : > { %v1467_v55 = vsub.f32 1.0, %v1466_v14 }
 0xa5c   : > { %v1468_v56 = vmul.f32 %v2203_v54, %v1467_v55 }
 0xa5e   : > { %v1469_v57 = vadd.f32 %v2203_v54, %v1468_v56 }
 0xa60   : > { %v1473_v58 = vsel %vm1472_vm13, %v2203_v54, %v1469_v57  ;;  %v2704_v57 = vld [vmem:[%s654_s23] sm:$0xff] }
 0xa61   : > { %v1478_v59 = vsel %vm1475_vm14, %v1477_v46, %v1473_v58  ;;  %v1674_v46 = vmul.f32 %v2677_v9, %v2704_v57 }
 0xa62   : > { %v2662_v61 = vmul.f32 %v2201_v10, %v1478_v59 }
 0xa63   : > { %v1675_v58 = vsel %vm692_vm3, %v1674_v46, 0.0 }
 0xa64   : > { %v1480_v1 = vperm.slane %v2662_v61, 0 }
 0xa66   : > { %v1481_v2 = vmul.f32 %v1480_v1, %v2370_v3 }
 0xa68   : > { %v1482_v4 = vsel %vm692_vm3, %v1481_v2, 0.0  ;;  %v1678_v2 = vlaneseq }
 0xa69   : > { %1483 = vadd.xlane.f32.xlu1 %v1482_v4 }
 0xa6a   : > { %v1679_v4 = vand.u32 127, %v1678_v2 }
 0xa6c   : > { %vm1680_vm12 = vcmp.eq.s32.totalorder %v1679_v4, 0  ;;  %vm1697_vm13 = vcmp.eq.s32.totalorder %v1679_v4, 1 }
 0xa6d   : > { %v2714_v7 = vsel %vm1680_vm12, 1.0, %v2235_v62 }
 0xa82   : > { %1690 = vrot.lane.b32.xlu1 %v2677_v9, %s2236_s29 }
 0xadc   : > { %v1484_v3 = vpop.xlane.xlu1 %1483 }
 0xadd   : > { %v1486_v11 = vadd.f32 %v2657_v39, %v1484_v3 }
 0xadf   : > { %v1491_v40 = vmul.f32 %v2682_v12, %v1486_v11 }
 0xae1   : > { %v2134_v13 = vmul.f32 -1.442695, %v1491_v40 }
 0xae3   : > { %2204 = vpow2.f32 %v2134_v13 }
 0xae9   : > { %v2205_v15 = vpop.eup %2204 }
 0xaea   : > { %v1495_v16 = vadd.f32 1.0, %v2205_v15 }
 0xaec   : > { %2206 = vrcp.f32 %v1495_v16  ;;  %v1507_v21 = vand.u32 2147483648, %v1495_v16  ;;  %v1505_v23 = vand.u32 2147483647, %v1495_v16  ;;  %vm1501_vm15 = vweird.f32 %v1495_v16 }
 0xaee   : > { %v1508_v26 = vor.u32 1.1754944e-38, %v1507_v21  ;;  %vm1506_vm5 = vcmp.eq.f32.partialorder %v1505_v23, 8.507059e+37  ;;  %v2728_v21 = vsel %vm1697_vm13, 1.0, %v2235_v62 }
 0xaf2   : > { %v2207_v17 = vpop.eup %2206 }
 0xaf3   : > { %v1497_v18 = vmul.f32 %v2207_v17, %v1495_v16  ;;  %vm1502_vm7 = vweird.f32 %v2207_v17  ;;  %v1255_v16 = vadd.f32 %v2646_v60, %v2607_v42  ;;  %v1313_v60 = vadd.f32 %v2653_v32, %v2607_v42  ;;  %v1370_v32 = vpop.f32.mrf.mxu2 }
 0xaf4   : > { %vm1503_vm1 = vmor %vm1501_vm15, %vm1502_vm7  ;;  %v1691_v40 = vpop.permute.xlu1 %1690 }
 0xaf5   : > { %v1498_v19 = vsub.f32 1.0, %v1497_v18  ;;  %v1693_v13 = vmul.f32 %v1691_v40, %v2704_v57 }
 0xaf7   : > { %v1499_v22 = vmul.f32 %v2207_v17, %v1498_v19  ;;  %v1694_v15 = vsel %vm692_vm3, %v1693_v13, 0.0 }
 0xaf9   : > { %v1500_v25 = vadd.f32 %v2207_v17, %v1499_v22 }
 0xafb   : > { %v1504_v27 = vsel %vm1503_vm1, %v2207_v17, %v1500_v25  ;;  %v1257_v17 = vadd.f32 %v1255_v16, %v2674_v6  ;;  %v1315_v25 = vadd.f32 %v1313_v60, %v2674_v6 }
 0xafc   : > { %v1509_v28 = vsel %vm1506_vm5, %v1508_v26, %v1504_v27 }
 0xafd   : > { %vm1511_vm8 = vcmp.gt.f32.partialorder %v1509_v28, 0.5  ;;  %v2723_v18 = vperm.slane %v1257_v17, 0  ;;  %v2737_v27 = vperm.slane %v1315_v25, 0 }
 0xafe   : > { %v2135_v63 = vsel %vm1511_vm8, 1.0, %v2235_v62 }
 0xaff   : > { %v1514_v30 = vmul.f32 %v2135_v63, %v2580_v0  ;;  %v1515_v31 = vsub.f32 1.0, %v2135_v63  ;;  %v1707_v26 = vmul.f32 %v2723_v18, %v2704_v57  ;;  %v1732_v63 = vmul.f32 %v2737_v27, %v2704_v57 }
 0xb01   : > { %1560 = vperm.xlu2 %2162, %v1514_v30   ;;  %v1517_v33 = vsel %vm1005_vm0, %v1514_v30, 0.0  ;;  %v1516_v36 = vmul.f32 %v1515_v31, %v2580_v0  ;;  %v1708_v28 = vsel %vm692_vm3, %v1707_v26, 0.0  ;;  %v1733_v30 = vsel %vm692_vm3, %v1732_v63, 0.0 }
 0xb02   : > { %v1518_v37 = vrot.slane %v1517_v33, 4  ;;  %v1371_v31 = vadd.f32 %v1370_v32, %v2607_v42 }
 0xb03   : > { %v1525_v8 = vsel %vm1005_vm0, %v1516_v36, 0.0 }
 0xb04   : > { %v1519_v48 = vadd.f32 %v1518_v37, %v1517_v33  ;;  %v1526_v49 = vrot.slane %v1525_v8, 4  ;;  %v1373_v33 = vadd.f32 %v1371_v31, %v2674_v6 }
 0xb06   : > { %v1520_v10 = vrot.slane %v1519_v48, 2  ;;  %v1527_v50 = vadd.f32 %v1526_v49, %v1525_v8 }
 0xb08   : > { %v1528_v52 = vrot.slane %v1527_v50, 2  ;;  %v1521_v54 = vadd.f32 %v1520_v10, %v1519_v48 }
 0xb09   : > { %1618 = vperm.xlu2 %2162, %v1516_v36   ;;  %v2747_v36 = vperm.slane %v1373_v33, 0 }
 0xb0a   : > { %v1522_v14 = vrot.slane %v1521_v54, 1  ;;  %v1529_v55 = vadd.f32 %v1528_v52, %v1527_v50  ;;  %v1781_v50 = vmul.f32 %v1181_v47, %v2704_v57 }
 0xb0b   : > { %v1757_v37 = vmul.f32 %v2747_v36, %v2704_v57 }
 0xb0c   : > { %v2690_v43 = vadd.f32 %v1522_v14, %v1521_v54  ;;  %v1530_v56 = vrot.slane %v1529_v55, 1  ;;  %v1782_v52 = vsel %vm692_vm3, %v1781_v50, 0.0  ;;  %v1962_v54 = vmul.f32 %v970_v35, %v2704_v57 }
 0xb0d   : > { %v1758_v10 = vsel %vm692_vm3, %v1757_v37, 0.0 }
 0xb0e   : > { %v2692_v45 = vadd.f32 %v1530_v56, %v1529_v55  ;;  %vm1524_vm10 = vcmp.eq.f32.partialorder %v2690_v43, 0.0  ;;  %v1963_v14 = vsel %vm692_vm3, %v1962_v54, 0.0 }
 0xb10   : > { %vm1532_vm6 = vcmp.eq.f32.partialorder %v2692_v45, 0.0  ;;  %v1615_v32 = vadd.f32 1e-08, %v2692_v45 }
 0xb11   : > { %vm2696_vm0 = vmor %vm1524_vm10, %vm1532_vm6 }
 0xb32   : > { %1676 = vadd.xlane.f32.xlu2 %v1675_v58 }
 0xb5b   : > { %v2709_v59 = vpop.permute.xlu2 %1560 }
 0xb63   : > { %v2711_v5 = vpop.permute.xlu2 %1618 }
 0xb64   : > { %v1621_v45 = vmul.f32 %v2711_v5, %v2493_v51 }
 0xb66   : > { %v1622_v54 = vsel %vm734_vm4, %v1621_v45, 0.0  ;;  %v1553_v45 = vpop.f32.mrf.mxu0 }
 0xba5   : > { %v1677_v3 = vpop.xlane.xlu2 %1676 }
 0xba6   : > { %v1683_v11 = vmul.f32 %v2714_v7, %v1677_v3 }
 0xba8   : > { %1685 = vrot.lane.b32.xlu0 %v1683_v11, %s2237_s24 }
 0xbd2   : > { %1695 = vadd.xlane.f32.xlu0 %v1694_v15 }
 0xbe6   : > { %1718 = vrot.lane.b32.xlu0 %v2723_v18, %s2236_s29 }
 0xc1a   : > { %v1686_v19 = vpop.permute.xlu0 %1685 }
 0xc1b   : > { %v1688_v8 = vadd.f32 %v1686_v19, %v2677_v9 }
 0xc45   : > { %v1696_v22 = vpop.xlane.xlu0 %1695 }
 0xc46   : > { %v1700_v23 = vmul.f32 %v2728_v21, %v1696_v22 }
 0xc48   : > { %1702 = vrot.lane.b32.xlu1 %v1700_v23, %s2237_s24 }
 0xc58   : > { %v1719_v56 = vpop.permute.xlu0 %1718 }
 0xc59   : > { %v1721_v46 = vmul.f32 %v1719_v56, %v2704_v57 }
 0xc5b   : > { %v1722_v41 = vsel %vm692_vm3, %v1721_v46, 0.0 }
 0xc72   : > { %1709 = vadd.xlane.f32.xlu1 %v1708_v28 }
 0xc7a   : > { %1734 = vadd.xlane.f32.xlu1 %v1733_v30  ;;  %v1557_v30 = vadd.f32 1e-08, %v2690_v43 }
 0xc93   : > { %1743 = vrot.lane.b32.xlu1 %v2737_v27, %s2236_s29 }
 0xcba   : > { %v1703_v48 = vpop.permute.xlu1 %1702 }
 0xcbb   : > { %v2752_v49 = vadd.f32 %v1703_v48, %v1688_v8  ;;  %v1563_v8 = vmul.f32 %v2709_v59, %v2493_v51 }
 0xcbd   : > { %1759 = vadd.xlane.f32.xlu1 %v1758_v10  ;;  %v1564_v48 = vsel %vm734_vm4, %v1563_v8, 0.0 }
 0xcbe   : > { %v1565_v10 = vrot.slane %v1564_v48, 4 }
 0xcc0   : > { %v1566_v50 = vadd.f32 %v1565_v10, %v1564_v48 }
 0xcc5   : > { %1783 = vadd.xlane.f32.xlu1 %v1782_v52 }
 0xccd   : > { %1964 = vadd.xlane.f32.xlu1 %v1963_v14  ;;  %v1567_v14 = vrot.slane %v1566_v50, 2 }
 0xccf   : > { %v1568_v56 = vadd.f32 %v1567_v14, %v1566_v50  ;;  %v1554_v50 = vadd.f32 %v1553_v45, %v2607_v42 }
 0xce5   : > { %v1710_v9 = vpop.xlane.xlu1 %1709 }
 0xce6   : > { %v1711_v55 = vmul.f32 %v2714_v7, %v1710_v9  ;;  %v1623_v9 = vrot.slane %v1622_v54, 4 }
 0xce8   : > { %1713 = vrot.lane.b32.xlu2 %v1711_v55, %s2237_s24  ;;  %v1624_v46 = vadd.f32 %v1623_v9, %v1622_v54  ;;  %v1556_v54 = vadd.f32 %v1554_v50, %v2674_v6 }
 0xcea   : > { %v2806_v9 = vperm.slane %v1556_v54, 0 }
 0xced   : > { %v1735_v47 = vpop.xlane.xlu1 %1734 }
 0xcee   : > { %v1736_v63 = vmul.f32 %v2714_v7, %v1735_v47 }
 0xd05   : > { %v1744_v58 = vpop.permute.xlu1 %1743 }
 0xd06   : > { %v1746_v31 = vmul.f32 %v1744_v58, %v2704_v57  ;;  %v1569_v58 = vrot.slane %v1568_v56, 1 }
 0xd08   : > { %v1747_v33 = vsel %vm692_vm3, %v1746_v31, 0.0 }
 0xd11   : > { %1723 = vadd.xlane.f32.xlu2 %v1722_v41 }
 0xd30   : > { %v2767_v2 = vpop.xlane.xlu1 %1759 }
 0xd31   : > { %v1761_v10 = vmul.f32 %v2714_v7, %v2767_v2 }
 0xd38   : > { %v1784_v34 = vpop.xlane.xlu1 %1783 }
 0xd39   : > { %v1785_v35 = vadd.f32 %v1784_v34, %v2614_v24 }
 0xd3b   : > { %v1786_v4 = vmul.f32 %v1785_v35, %v2628_v53  ;;  %v1625_v35 = vrot.slane %v1624_v46, 2 }
 0xd3d   : > { %v2142_v3 = vmul.f32 -1.442695, %v1786_v4 }
 0xd3f   : > { %2208 = vpow2.f32 %v2142_v3 }
 0xd42   : > { %v2774_v53 = vpop.permute.xlu2 %1713 }
 0xd45   : > { %v2209_v11 = vpop.eup %2208 }
 0xd46   : > { %v1790_v40 = vadd.f32 1.0, %v2209_v11  ;;  %v1570_v11 = vadd.f32 %v1569_v58, %v1568_v56  ;;  %v1835_v56 = vmul.f32 %v2806_v9, %v2704_v57 }
 0xd48   : > { %2210 = vrcp.f32 %v1790_v40  ;;  %v1802_v17 = vand.u32 2147483648, %v1790_v40  ;;  %v1800_v22 = vand.u32 2147483647, %v1790_v40  ;;  %vm1796_vm7 = vweird.f32 %v1790_v40 }
 0xd49   : > { %v1836_v2 = vsel %vm692_vm3, %v1835_v56, 0.0 }
 0xd4a   : > { %v1803_v60 = vor.u32 1.1754944e-38, %v1802_v17  ;;  %vm1801_vm1 = vcmp.eq.f32.partialorder %v1800_v22, 8.507059e+37 }
 0xd4e   : > { %v2211_v13 = vpop.eup %2210 }
 0xd4f   : > { %v1792_v15 = vmul.f32 %v2211_v13, %v1790_v40  ;;  %vm1797_vm14 = vweird.f32 %v2211_v13 }
 0xd50   : > { %vm1798_vm15 = vmor %vm1796_vm7, %vm1797_vm14 }
 0xd51   : > { %v1793_v16 = vsub.f32 1.0, %v1792_v15 }
 0xd53   : > { %v1794_v19 = vmul.f32 %v2211_v13, %v1793_v16 }
 0xd55   : > { %v1795_v23 = vadd.f32 %v2211_v13, %v1794_v19 }
 0xd57   : > { %v1799_v25 = vsel %vm1798_vm15, %v2211_v13, %v1795_v23  ;;  %v1626_v13 = vadd.f32 %v1625_v35, %v1624_v46 }
 0xd58   : > { %v2771_v24 = vsel %vm1801_vm1, %v1803_v60, %v1799_v25 }
 0xd59   : > { %1815 = vperm.xlu1 %2164, %v2771_v24   ;;  %v1627_v60 = vrot.slane %v1626_v13, 1 }
 0xd84   : > { %v1724_v26 = vpop.xlane.xlu2 %1723 }
 0xd85   : > { %v1725_v28 = vmul.f32 %v2728_v21, %v1724_v26 }
 0xd87   : > { %1727 = vrot.lane.b32.xlu0 %v1725_v28, %s2237_s24 }
 0xd8f   : > { %1738 = vrot.lane.b32.xlu0 %v1736_v63, %s2237_s24 }
 0xd97   : > { %1573 = vperm.xlu0 %2163, %v1557_v30   ;;  %v1628_v30 = vadd.f32 %v1627_v60, %v1626_v13 }
 0xd9f   : > { %1631 = vperm.xlu0 %2163, %v1615_v32  }
 0xdc9   : > { %1748 = vadd.xlane.f32.xlu0 %v1747_v33 }
 0xddd   : > { %1768 = vrot.lane.b32.xlu0 %v2747_v36, %s2236_s29 }
 0xdf9   : > { %v2786_v37 = vpop.permute.xlu0 %1727 }
 0xe01   : > { %v2791_v43 = vpop.permute.xlu0 %1738 }
 0xe02   : > { %v1741_v46 = vadd.f32 %v2791_v43, %v2737_v27  ;;  %v1909_v43 = vmul.f32 %v1480_v1, %v2704_v57 }
 0xe09   : > { %v1574_v52 = vpop.permute.xlu0 %1573 }
 0xe0a   : > { %2212 = vrcp.f32 %v1574_v52  ;;  %v1587_v34 = vand.u32 2147483648, %v1574_v52  ;;  %v1585_v51 = vand.u32 2147483647, %v1574_v52  ;;  %vm1581_vm8 = vweird.f32 %v1574_v52 }
 0xe0c   : > { %v1588_v40 = vor.u32 1.1754944e-38, %v1587_v34  ;;  %vm1586_vm6 = vcmp.eq.f32.partialorder %v1585_v51, 8.507059e+37 }
 0xe10   : > { %v2213_v55 = vpop.eup %2212 }
 0xe11   : > { %v1577_v41 = vmul.f32 %v2213_v55, %v1574_v52  ;;  %v1632_v59 = vpop.permute.xlu0 %1631  ;;  %vm1582_vm5 = vweird.f32 %v2213_v55 }
 0xe12   : > { %2214 = vrcp.f32 %v1632_v59  ;;  %vm1583_vm10 = vmor %vm1581_vm8, %vm1582_vm5  ;;  %v1645_v23 = vand.u32 2147483648, %v1632_v59  ;;  %v1643_v26 = vand.u32 2147483647, %v1632_v59  ;;  %vm1639_vm13 = vweird.f32 %v1632_v59 }
 0xe13   : > { %v1578_v47 = vsub.f32 1.0, %v1577_v41 }
 0xe14   : > { %v1646_v63 = vor.u32 1.1754944e-38, %v1645_v23  ;;  %vm1644_vm7 = vcmp.eq.f32.partialorder %v1643_v26, 8.507059e+37 }
 0xe15   : > { %v1579_v4 = vmul.f32 %v2213_v55, %v1578_v47 }
 0xe17   : > { %v1580_v5 = vadd.f32 %v2213_v55, %v1579_v4 }
 0xe18   : > { %v2215_v3 = vpop.eup %2214 }
 0xe19   : > { %v1584_v15 = vsel %vm1583_vm10, %v2213_v55, %v1580_v5  ;;  %v1635_v16 = vmul.f32 %v2215_v3, %v1632_v59  ;;  %vm1640_vm12 = vweird.f32 %v2215_v3 }
 0xe1a   : > { %v1589_v17 = vsel %vm1586_vm6, %v1588_v40, %v1584_v15  ;;  %vm1641_vm14 = vmor %vm1639_vm13, %vm1640_vm12  ;;  %v1910_v40 = vsel %vm692_vm3, %v1909_v43, 0.0 }
 0xe1b   : > { %v1636_v19 = vsub.f32 1.0, %v1635_v16  ;;  %v1590_v22 = vmul.f32 %v1589_v17, %v1570_v11  ;;  %v1806_v16 = vsub.f32 1.0, %v2771_v24  ;;  %v2127_v17 = vsel %vm2636_vm11, 1.0, %v2235_v62  ;;  %v1965_v24 = vpop.xlane.xlu1 %1964 }
 0xe1d   : > { %v1637_v25 = vmul.f32 %v2215_v3, %v1636_v19  ;;  %2138 = vmatmul.msk.f32.vlgmr.msra.gmra.mxu2 %vm734_vm4, %v1590_v22  ;;  %v1826_v19 = vsub.f32 1.0, %v2127_v17 }
 0xe1f   : > { %v1638_v28 = vadd.f32 %v2215_v3, %v1637_v25 }
 0xe21   : > { %v1642_v32 = vsel %vm1641_vm14, %v2215_v3, %v1638_v28 }
 0xe22   : > { %v1647_v31 = vsel %vm1644_vm7, %v1646_v63, %v1642_v32 }
 0xe23   : > { %v1648_v33 = vmul.f32 %v1647_v31, %v1628_v30  ;;  %v2843_v30 = vsel %vm2696_vm0, 1.0, %v2235_v62 }
 0xe24   : > { %v2165_v31 = vpack.i.bf16 %v2843_v30, %v2127_v17 }
 0xe25   : > { %2139 = vmatmul.msk.f32.vlgmr.msrb.gmra.mxu1 %vm734_vm4, %v1648_v33 }
 0xe3c   : > { %v1749_v8 = vpop.xlane.xlu0 %1748 }
 0xe3d   : > { %v1750_v48 = vmul.f32 %v2728_v21, %v1749_v8  ;;  %v1816_v8 = vpop.permute.xlu1 %1815 }
 0xe3f   : > { %1752 = vrot.lane.b32.xlu2 %v1750_v48, %s2237_s24 }
 0xe47   : > { %1763 = vrot.lane.b32.xlu2 %v1761_v10, %s2237_s24 }
 0xe4f   : > { %v1769_v52 = vpop.permute.xlu0 %1768 }
 0xe50   : > { %v1771_v14 = vmul.f32 %v1769_v52, %v2704_v57 }
 0xe52   : > { %v1772_v55 = vsel %vm692_vm3, %v1771_v14, 0.0 }
 0xe70   : > { %1773 = vadd.xlane.f32.xlu2 %v1772_v55 }
 0xe78   : > { %1837 = vadd.xlane.f32.xlu2 %v1836_v2 }
 0xe90   : > { %1846 = vrot.lane.b32.xlu2 %v2806_v9, %s2236_s29 }
 0xe99   : > { %v1753_v41 = vpop.permute.xlu2 %1752 }
 0xe9a   : > { %v1755_v59 = vadd.f32 %v1753_v41, %v1741_v46 }
 0xe9c   : > { %v1818_v10 = vmul.f32 %v1816_v8, %v1755_v59 }
 0xea0   : > { %v1611_v29 = vpop.f32.mrf.mxu2 }
 0xea1   : > { %v1764_v4 = vpop.permute.xlu2 %1763 }
 0xea2   : > { %v1669_v47 = vpop.f32.mrf.mxu1 }
 0xea3   : > { %v1670_v58 = vadd.f32 %v1669_v47, %v2607_v42 }
 0xea5   : > { %v1672_v34 = vadd.f32 %v1670_v58, %v2674_v6 }
 0xea7   : > { %v2818_v35 = vperm.slane %v1672_v34, 0 }
 0xea9   : > { %1896 = vrot.lane.b32.xlu1 %v2818_v35, %s2236_s29  ;;  %v1885_v34 = vmul.f32 %v2818_v35, %v2704_v57 }
 0xee3   : > { %v1774_v51 = vpop.xlane.xlu2 %1773 }
 0xee4   : > { %v1775_v5 = vmul.f32 %v2728_v21, %v1774_v51 }
 0xee6   : > { %1777 = vrot.lane.b32.xlu0 %v1775_v5, %s2237_s24 }
 0xeeb   : > { %v1838_v3 = vpop.xlane.xlu2 %1837 }
 0xeec   : > { %v1839_v27 = vmul.f32 %v2714_v7, %v1838_v3 }
 0xeee   : > { %1841 = vrot.lane.b32.xlu2 %v1839_v27, %s2237_s24 }
 0xef3   : > { %v1847_v11 = vpop.permute.xlu2 %1846 }
 0xef4   : > { %v1849_v13 = vmul.f32 %v1847_v11, %v2704_v57  ;;  %v1716_v11 = vadd.f32 %v2774_v53, %v2723_v18 }
 0xef6   : > { %v1850_v15 = vsel %vm692_vm3, %v1849_v13, 0.0 }
 0xf10   : > { %1911 = vadd.xlane.f32.xlu0 %v1910_v40 }
 0xf17   : > { %1851 = vadd.xlane.f32.xlu2 %v1850_v15  ;;  %v1730_v15 = vadd.f32 %v2786_v37, %v1716_v11 }
 0xf1b   : > { %v1897_v51 = vpop.permute.xlu1 %1896 }
 0xf1c   : > { %v1899_v5 = vmul.f32 %v1897_v51, %v2704_v57 }
 0xf1e   : > { %v1900_v3 = vsel %vm692_vm3, %v1899_v5, 0.0 }
 0xf24   : > { %1809 = vperm.xlu0 %2163, %v1806_v16  }
 0xf2c   : > { %1829 = vperm.xlu0 %2163, %v1826_v19  }
 0xf48   : > { %v1842_v1 = vpop.permute.xlu2 %1841 }
 0xf49   : > { %v1844_v40 = vadd.f32 %v1842_v1, %v2806_v9 }
 0xf58   : > { %v1778_v61 = vpop.permute.xlu0 %1777 }
 0xf83   : > { %v1912_v22 = vpop.xlane.xlu0 %1911 }
 0xf84   : > { %v1913_v23 = vadd.f32 %v1912_v22, %v2657_v39  ;;  %v1612_v39 = vadd.f32 %v1611_v29, %v2607_v42 }
 0xf86   : > { %v1914_v60 = vmul.f32 %v1913_v23, %v2682_v12  ;;  %v1766_v12 = vadd.f32 %v1764_v4, %v2747_v36  ;;  %v1614_v45 = vadd.f32 %v1612_v39, %v2674_v6  ;;  %v1886_v4 = vsel %vm692_vm3, %v1885_v34, 0.0 }
 0xf88   : > { %v2143_v25 = vmul.f32 -1.442695, %v1914_v60  ;;  %v1780_v33 = vadd.f32 %v1778_v61, %v1766_v12  ;;  %v2849_v14 = vperm.slane %v1614_v45, 0  ;;  %v1966_v60 = vadd.f32 %v1965_v24, %v2568_v38 }
 0xf8a   : > { %2216 = vpow2.f32 %v2143_v25  ;;  %v1852_v26 = vpop.xlane.xlu2 %1851  ;;  %v1860_v47 = vmul.f32 %v2849_v14, %v2704_v57 }
 0xf8b   : > { %v1853_v28 = vmul.f32 %v2728_v21, %v1852_v26  ;;  %v1967_v26 = vmul.f32 %v1966_v60, %v2573_v44 }
 0xf8c   : > { %v1861_v58 = vsel %vm692_vm3, %v1860_v47, 0.0 }
 0xf8d   : > { %1855 = vrot.lane.b32.xlu0 %v1853_v28, %s2237_s24  ;;  %v2144_v28 = vmul.f32 -1.442695, %v1967_v26 }
 0xf90   : > { %v2217_v63 = vpop.eup %2216 }
 0xf91   : > { %v1918_v32 = vadd.f32 1.0, %v2217_v63 }
 0xf93   : > { %2218 = vrcp.f32 %v1918_v32  ;;  %v1930_v42 = vand.u32 2147483648, %v1918_v32  ;;  %v1928_v56 = vand.u32 2147483647, %v1918_v32  ;;  %vm1924_vm11 = vweird.f32 %v1918_v32 }
 0xf94   : > { %2220 = vpow2.f32 %v2144_v28 }
 0xf95   : > { %2166 = vperm.xlu0 %2163, %v2165_v31   ;;  %v1931_v46 = vor.u32 1.1754944e-38, %v1930_v42  ;;  %vm1929_vm15 = vcmp.eq.f32.partialorder %v1928_v56, 8.507059e+37 }
 0xf96   : > { %v1810_v48 = vpop.permute.xlu0 %1809 }
 0xf97   : > { %v1812_v50 = vmul.f32 %v1810_v48, %v1780_v33 }
 0xf99   : > { %v2219_v52 = vpop.eup %2218  ;;  %v1819_v0 = vadd.f32 %v1818_v10, %v1812_v50  ;;  %v2119_v50 = vsel %vm2587_vm9, 1.0, %v2235_v62 }
 0xf9a   : > { %v1920_v54 = vmul.f32 %v2219_v52, %v1918_v32  ;;  %vm1925_vm4 = vweird.f32 %v2219_v52  ;;  %v2221_v18 = vpop.eup %2220 }
 0xf9b   : > { %vm1926_vm0 = vmor %vm1924_vm11, %vm1925_vm4  ;;  %v1971_v53 = vadd.f32 1.0, %v2221_v18 }
 0xf9c   : > { %v1921_v55 = vsub.f32 1.0, %v1920_v54 }
 0xf9d   : > { %1871 = vrot.lane.b32.xlu0 %v2849_v14, %s2236_s29  ;;  %2222 = vrcp.f32 %v1971_v53  ;;  %v1983_v12 = vand.u32 2147483648, %v1971_v53  ;;  %vm1977_vm5 = vweird.f32 %v1971_v53  ;;  %v1981_v24 = vand.u32 2147483647, %v1971_v53 }
 0xf9e   : > { %v1922_v36 = vmul.f32 %v2219_v52, %v1921_v55  ;;  %v1830_v27 = vpop.permute.xlu0 %1829 }
 0xf9f   : > { %v1832_v61 = vmul.f32 %v1830_v27, %v1819_v0  ;;  %v1984_v33 = vor.u32 1.1754944e-38, %v1983_v12  ;;  %vm1982_vm10 = vcmp.eq.f32.partialorder %v1981_v24, 8.507059e+37 }
 0xfa0   : > { %v1923_v2 = vadd.f32 %v2219_v52, %v1922_v36 }
 0xfa2   : > { %v1927_v41 = vsel %vm1926_vm0, %v2219_v52, %v1923_v2  ;;  %v2007_v52 = vsub.f32 1.0, %v2119_v50 }
 0xfa3   : > { %v2853_v6 = vsel %vm1929_vm15, %v1931_v46, %v1927_v41  ;;  %v2223_v9 = vpop.eup %2222 }
 0xfa4   : > { %v1934_v59 = vsub.f32 1.0, %v2853_v6  ;;  %v1973_v37 = vmul.f32 %v2223_v9, %v1971_v53  ;;  %vm1978_vm1 = vweird.f32 %v2223_v9 }
 0xfa5   : > { %vm1979_vm8 = vmor %vm1977_vm5, %vm1978_vm1 }
 0xfa6   : > { %1937 = vperm.xlu1 %2164, %v1934_v59   ;;  %v1974_v1 = vsub.f32 1.0, %v1973_v37 }
 0xfa8   : > { %v1975_v29 = vmul.f32 %v2223_v9, %v1974_v1 }
 0xfaa   : > { %v1976_v32 = vadd.f32 %v2223_v9, %v1975_v29 }
 0xfac   : > { %v1980_v44 = vsel %vm1979_vm8, %v2223_v9, %v1976_v32 }
 0xfad   : > { %v1985_v8 = vsel %vm1982_vm10, %v1984_v33, %v1980_v44 }
 0xfae   : > { %v1987_v10 = vsub.f32 1.0, %v1985_v8 }
 0xfc7   : > { %1862 = vadd.xlane.f32.xlu0 %v1861_v58 }
 0xfd0   : > { %1887 = vadd.xlane.f32.xlu1 %v1886_v4 }
 0xfd8   : > { %1901 = vadd.xlane.f32.xlu1 %v1900_v3 }
 0xfff   : > { %v1856_v43 = vpop.permute.xlu0 %1855 }
0x1000   : > { %v1858_v16 = vadd.f32 %v1856_v43, %v1844_v40 }
0x1007   : > { %v2167_v13 = vpop.permute.xlu0 %2166 }
0x1008   : > { %v2169_v17 = vunpack.i.h.bf16 %v2167_v13  ;;  %v2168_v19 = vunpack.i.l.bf16 %v2167_v13 }
0x100a   : > { %v2868_v22 = vmul.f32 %v2169_v17, %v1858_v16  ;;  %v1825_v23 = vmul.f32 %v2168_v19, %v1730_v15 }
0x100c   : > { %v2871_v25 = vadd.f32 %v1832_v61, %v1825_v23 }
0x100f   : > { %v1872_v63 = vpop.permute.xlu0 %1871 }
0x1010   : > { %v1874_v0 = vmul.f32 %v1872_v63, %v2704_v57 }
0x1012   : > { %v1875_v54 = vsel %vm692_vm3, %v1874_v0, 0.0 }
0x1018   : > { %v1938_v31 = vpop.permute.xlu1 %1937 }
0x103a   : > { %v1863_v39 = vpop.xlane.xlu0 %1862 }
0x103b   : > { %v1864_v38 = vmul.f32 %v2714_v7, %v1863_v39 }
0x103d   : > { %1866 = vrot.lane.b32.xlu1 %v1864_v38, %s2237_s24 }
0x1043   : > { %v1888_v48 = vpop.xlane.xlu1 %1887 }
0x1044   : > { %v1889_v45 = vmul.f32 %v2714_v7, %v1888_v48  ;;  %v1954_v7 = vsub.f32 1.0, %v2843_v30 }
0x1045   : > { %1990 = vperm.xlu1 %2164, %v1987_v10  }
0x1046   : > { %1891 = vrot.lane.b32.xlu0 %v1889_v45, %s2237_s24 }
0x104b   : > { %v1902_v55 = vpop.xlane.xlu1 %1901 }
0x104c   : > { %v1903_v42 = vmul.f32 %v2728_v21, %v1902_v55 }
0x104d   : > { %2010 = vperm.xlu1 %2164, %v2007_v52  }
0x1070   : > { %1876 = vadd.xlane.f32.xlu0 %v1875_v54 }
0x1084   : > { %1905 = vrot.lane.b32.xlu0 %v1903_v42, %s2237_s24 }
0x108c   : > { %1957 = vperm.xlu0 %2163, %v1954_v7  }
0x1094   : > { %2003 = vperm.xlu0 %2163, %v2119_v50  }
0x10af   : > { %v1867_v57 = vpop.permute.xlu1 %1866 }
0x10b0   : > { %v1869_v41 = vadd.f32 %v1867_v57, %v2849_v14 }
0x10b8   : > { %v1892_v36 = vpop.permute.xlu0 %1891 }
0x10b9   : > { %v1894_v46 = vadd.f32 %v1892_v36, %v2818_v35 }
0x10e3   : > { %v1877_v56 = vpop.xlane.xlu0 %1876 }
0x10e4   : > { %v1878_v62 = vmul.f32 %v2728_v21, %v1877_v56  ;;  %v1991_v21 = vpop.permute.xlu1 %1990 }
0x10e6   : > { %1880 = vrot.lane.b32.xlu2 %v1878_v62, %s2237_s24 }
0x10ec   : > { %v2011_v40 = vpop.permute.xlu1 %2010 }
0x10ee   : > { %1943 = vperm.xlu2 %2162, %v2853_v6  }
0x10f6   : > { %1996 = vperm.xlu2 %2162, %v1985_v8   ;;  %v1906_v20 = vpop.permute.xlu0 %1905 }
0x10f7   : > { %v1908_v59 = vadd.f32 %v1906_v20, %v1894_v46 }
0x10f9   : > { %v1940_v34 = vmul.f32 %v1938_v31, %v1908_v59 }
0x10fe   : > { %v1958_v47 = vpop.permute.xlu0 %1957 }
0x1106   : > { %v2004_v11 = vpop.permute.xlu0 %2003 }
0x1107   : > { %v2006_v14 = vmul.f32 %v2004_v11, %v2752_v49 }
0x1140   : > { %v1881_v2 = vpop.permute.xlu2 %1880 }
0x1141   : > { %v1883_v30 = vadd.f32 %v1881_v2, %v1869_v41 }
0x1148   : > { %v1944_v58 = vpop.permute.xlu2 %1943 }
0x1149   : > { %v1946_v4 = vmul.f32 %v1944_v58, %v1883_v30 }
0x114b   : > { %v1947_v51 = vadd.f32 %v1946_v4, %v1940_v34 }
0x114d   : > { %v1960_v5 = vmul.f32 %v1958_v47, %v1947_v51 }
0x114f   : > { %v1961_v6 = vadd.f32 %v1960_v5, %v2868_v22 }
0x1150   : > { %v1997_v3 = vpop.permute.xlu2 %1996 }
0x1151   : > { %v1993_v27 = vmul.f32 %v1991_v21, %v1961_v6  ;;  %v1999_v43 = vmul.f32 %v1997_v3, %v2871_v25 }
0x1153   : > { %v2000_v35 = vadd.f32 %v1999_v43, %v1993_v27 }
0x1155   : > { %v2013_v13 = vmul.f32 %v2011_v40, %v2000_v35 }
0x1157   : > { %v2014_v15 = vadd.f32 %v2013_v13, %v2006_v14 }
0x1159   : > { %2016 = vrot.lane.b32.xlu2 %v2014_v15, %s2238_s22 }
0x11b3   : > { %v2017_v16 = vpop.permute.xlu2 %2016 }
0x11b4   : > { %2019 = vst.msk [vmem:[%s658_s3] sm:$0xff] %vm664_vm2, %v2017_v16 }
0x11b5 PF: > { %s30_s1 = sadd.s32 1, %s2230_s1  }
0x11b6   : > { %p27_p4 = scmp.ge.s32.totalorder %s30_s1, 4  }
0x11b8   :  { %29 = sbr.rel (!%p27_p4) target bundleno = 6 (0x6), region = 136 }

</bundles_post_ra>
